<compile_context>
chip_gen: v6e
topology: v6e:2x2x1
jax: 0.10.0
libtpu: 0.0.40
codegen_flags: <defaults>
</compile_context>

<pallas_src>
import math

import jax
import jax.numpy as jnp
from jax.experimental import pallas as pl
from jax.experimental.pallas import tpu as pltpu

# ---- synthetic model hyper-parameters (small shapes) ----
VOCAB = 64
HIDDEN = 32
NUM_HEADS = 4
HEAD_DIM = HIDDEN // NUM_HEADS
INTERMEDIATE = 64
NUM_LAYERS = 2
NUM_LABELS = 2
RMS_EPS = 1e-6

BATCH = 2
SEQ = 8

# bf16 matmul inputs, f32 accumulation -- native on every MXU generation.
MATMUL_DTYPE = jnp.bfloat16


def _rmsnorm(x, w):
    var = jnp.mean(x * x, axis=-1, keepdims=True)
    return x * jax.lax.rsqrt(var + RMS_EPS) * w


# ---------------------------------------------------------------------------
# Single fused kernel: embedding lookup + all layers + final RMSNorm + CLS +
# (identity) dropout + Linear classifier.
# ---------------------------------------------------------------------------
def fused_forward_kernel(ids_ref, mask_ref, embed_ref,
                         ln1_ref, wqkv_ref, wo_ref,
                         ln2_ref, wg_ref, wu_ref, wd_ref,
                         final_ln_ref, cls_w_ref, cls_b_ref,
                         out_ref):
    N = ids_ref.shape[0]                      # N = B*S, row order n = b*S + s
    B, S = mask_ref.shape
    D, H, Dh, I = HIDDEN, NUM_HEADS, HEAD_DIM, INTERMEDIATE
    G = H * B

    # ---- embedding lookup fused in-kernel: one-hot matmul on the MXU ----
    vocab_iota = jax.lax.broadcasted_iota(jnp.int32, (N, VOCAB), 1)
    one_hot = jnp.where(ids_ref[...] == vocab_iota, 1.0, 0.0).astype(MATMUL_DTYPE)
    h = jnp.dot(one_hot, embed_ref[...], preferred_element_type=jnp.float32)  # (N, D) f32

    # ---- additive causal + padding mask, built ONCE, reused by every layer ----
    row = jax.lax.broadcasted_iota(jnp.int32, (S, S), 0)
    col = jax.lax.broadcasted_iota(jnp.int32, (S, S), 1)
    causal = jnp.where(col <= row, 0.0, -1e9).astype(jnp.float32)          # (S, S)
    pad = (1.0 - mask_ref[...]) * jnp.float32(-1e9)                        # (B, S)
    add_mask = causal[None, :, :] + pad[:, None, :]                        # (B, S, S)

    for li in range(NUM_LAYERS):                                           # static unroll
        # ---------------- self attention ----------------
        x = _rmsnorm(h, ln1_ref[li]).astype(MATMUL_DTYPE)                  # (N, D)

        # head-major fused QKV: one leading-batch batched matmul, no lane slicing.
        xb = jnp.broadcast_to(x[None], (3 * H, N, D))                      # (3H, N, D) bf16
        qkv = jnp.einsum('and,adk->ank', xb, wqkv_ref[li],
                         preferred_element_type=jnp.float32)               # (3H, N, Dh)
        # leading-dim slices + sublane-aligned reshapes only (g = h*B + b)
        q = qkv[0:H].reshape(G, S, Dh).astype(MATMUL_DTYPE)                # scale pre-folded
        k = qkv[H:2 * H].reshape(G, S, Dh).astype(MATMUL_DTYPE)
        v = qkv[2 * H:3 * H].reshape(G, S, Dh).astype(MATMUL_DTYPE)

        # scores: ONE batched matmul for all heads; mask broadcast over heads (no
        # materialized H-replicated mask tensor)
        s = jnp.einsum('gsk,gtk->gst', q, k,
                       preferred_element_type=jnp.float32)                 # (G, S, S)
        s = (s.reshape(H, B, S, S) + add_mask[None]).reshape(G, S, S)

        s = s - jnp.max(s, axis=-1, keepdims=True)
        p = jnp.exp(s)
        p = p * pl.reciprocal(jnp.sum(p, axis=-1, keepdims=True), approx=True)
        p = p.astype(MATMUL_DTYPE)

        ctx = jnp.einsum('gst,gtk->gsk', p, v,
                         preferred_element_type=jnp.float32)               # (G, S, Dh)

        # output projection: head-batched matmul against resident wo (no weight copies),
        # then a cheap head-axis sum (avoids a head-minor relayout of ctx)
        ctx_h = ctx.reshape(H, N, Dh).astype(MATMUL_DTYPE)                 # (H, N, Dh)
        attn = jnp.einsum('hnk,hkd->hnd', ctx_h, wo_ref[li],
                          preferred_element_type=jnp.float32)              # (H, N, D)
        h = h + jnp.sum(attn, axis=0)

        # ---------------- SwiGLU MLP ----------------
        x2 = _rmsnorm(h, ln2_ref[li]).astype(MATMUL_DTYPE)                 # (N, D)
        gate = jnp.dot(x2, wg_ref[li], preferred_element_type=jnp.float32)  # (N, I)
        up = jnp.dot(x2, wu_ref[li], preferred_element_type=jnp.float32)    # (N, I)
        act = (jax.nn.silu(gate) * up).astype(MATMUL_DTYPE)
        h = h + jnp.dot(act, wd_ref[li], preferred_element_type=jnp.float32)

    # ---- classifier head: final RMSNorm -> CLS (token 0) -> dropout (eval: identity) -> Linear ----
    cls = h.reshape(B, S, D)[:, 0, :]                                      # (B, D)
    cls = _rmsnorm(cls, final_ln_ref[...]).astype(MATMUL_DTYPE)
    logits = jnp.dot(cls, cls_w_ref[...],
                     preferred_element_type=jnp.float32) + cls_b_ref[...]  # (B, NUM_LABELS)
    out_ref[...] = logits.astype(out_ref.dtype)


def sentiment_classifier_forward(params, input_ids, attention_mask):
    B, S = input_ids.shape
    ids = input_ids.reshape(B * S, 1).astype(jnp.int32)      # (N, 1) for in-kernel one-hot
    mask = attention_mask.astype(jnp.float32)                # (B, S)

    args = (ids, mask, params['embed'],
            params['ln1'], params['wqkv'], params['wo'],
            params['ln2'], params['wg'], params['wu'], params['wd'],
            params['final_ln'], params['cls_w'], params['cls_b'])

    logits = pl.pallas_call(
        fused_forward_kernel,
        in_specs=[pl.BlockSpec(memory_space=pltpu.MemorySpace.VMEM)] * len(args),
        out_specs=pl.BlockSpec(memory_space=pltpu.MemorySpace.VMEM),
        out_shape=jax.ShapeDtypeStruct((B, NUM_LABELS), jnp.float32),
    )(*args)
    return logits                                             # (B, NUM_LABELS)


# ---------------------------------------------------------------------------
# Parameter init (weights stacked per layer, head-major QKV, Q scale pre-folded).
# ---------------------------------------------------------------------------
def init_params(key):
    def normal(k, shape, scale=0.02):
        return scale * jax.random.normal(k, shape, dtype=jnp.float32)

    keys = jax.random.split(key, 9)
    L, H, D, Dh, I = NUM_LAYERS, NUM_HEADS, HIDDEN, HEAD_DIM, INTERMEDIATE

    # head-major projections; attention scale 1/sqrt(Dh) folded into Q columns
    wq = normal(keys[1], (L, H, D, Dh)) * (1.0 / math.sqrt(Dh))
    wk = normal(keys[2], (L, H, D, Dh))
    wv = normal(keys[3], (L, H, D, Dh))
    wqkv = jnp.concatenate([wq, wk, wv], axis=1).astype(MATMUL_DTYPE)   # (L, 3H, D, Dh)

    return {
        'embed': normal(keys[0], (VOCAB, D)).astype(MATMUL_DTYPE),
        'ln1': jnp.ones((L, 1, D), jnp.float32),
        'wqkv': wqkv,
        'wo': normal(keys[4], (L, H, Dh, D)).astype(MATMUL_DTYPE),      # head-major output proj
        'ln2': jnp.ones((L, 1, D), jnp.float32),
        'wg': normal(keys[5], (L, D, I)).astype(MATMUL_DTYPE),
        'wu': normal(keys[6], (L, D, I)).astype(MATMUL_DTYPE),
        'wd': normal(keys[7], (L, I, D)).astype(MATMUL_DTYPE),
        'final_ln': jnp.ones((1, D), jnp.float32),
        'cls_w': normal(keys[8], (D, NUM_LABELS)).astype(MATMUL_DTYPE),  # nn.Linear weight (T)
        'cls_b': jnp.zeros((1, NUM_LABELS), jnp.float32),                # nn.Linear bias
    }


if __name__ == "__main__":
    key = jax.random.PRNGKey(0)
    ids_key, _ = jax.random.split(key)

    input_ids = jax.random.randint(ids_key, (BATCH, SEQ), 0, VOCAB, dtype=jnp.int32)
    # second example has 2 padding positions at the end
    attention_mask = jnp.array(
        [[1] * SEQ,
         [1] * (SEQ - 2) + [0] * 2], dtype=jnp.int32)

    params = init_params(jax.random.PRNGKey(42))

    logits = sentiment_classifier_forward(params, input_ids, attention_mask)
    logits = jax.block_until_ready(logits)
    assert logits.shape == (BATCH, NUM_LABELS)
    print("KERNEL_OK")
</pallas_src>

<mosaic_0001>
module attributes {stable_mosaic.version = 11 : i64} {
  func.func @fused_forward_kernel(%arg0: memref<16x1xi32, #tpu.memory_space<vmem>>, %arg1: memref<2x8xf32, #tpu.memory_space<vmem>>, %arg2: memref<64x32xbf16, #tpu.memory_space<vmem>>, %arg3: memref<2x1x32xf32, #tpu.memory_space<vmem>>, %arg4: memref<2x12x32x8xbf16, #tpu.memory_space<vmem>>, %arg5: memref<2x4x8x32xbf16, #tpu.memory_space<vmem>>, %arg6: memref<2x1x32xf32, #tpu.memory_space<vmem>>, %arg7: memref<2x32x64xbf16, #tpu.memory_space<vmem>>, %arg8: memref<2x32x64xbf16, #tpu.memory_space<vmem>>, %arg9: memref<2x64x32xbf16, #tpu.memory_space<vmem>>, %arg10: memref<1x32xf32, #tpu.memory_space<vmem>>, %arg11: memref<32x2xbf16, #tpu.memory_space<vmem>>, %arg12: memref<1x2xf32, #tpu.memory_space<vmem>>, %arg13: memref<2x2xf32, #tpu.memory_space<vmem>>) attributes {dimension_semantics = [], scalar_prefetch = 0 : i64, scratch_operands = 0 : i64, tpu.core_type = #tpu.core_type<tc>} {
    %0 = tpu.iota {dimensions = array<i32: 1>} : vector<16x64xi32>
    %c0 = arith.constant 0 : index
    %c0_0 = arith.constant 0 : index
    %1 = vector.load %arg0[%c0, %c0_0] : memref<16x1xi32, #tpu.memory_space<vmem>>, vector<16x1xi32>
    %2 = vector.broadcast %1 : vector<16x1xi32> to vector<16x64xi32>
    %3 = arith.cmpi eq, %2, %0 : vector<16x64xi32>
    %cst = arith.constant 1.000000e+00 : f32
    %cst_1 = arith.constant 0.000000e+00 : f32
    %4 = vector.broadcast %cst : f32 to vector<16x64xf32>
    %5 = vector.broadcast %cst_1 : f32 to vector<16x64xf32>
    %6 = arith.select %3, %4, %5 : vector<16x64xi1>, vector<16x64xf32>
    %7 = arith.truncf %6 : vector<16x64xf32> to vector<16x64xbf16>
    %c0_2 = arith.constant 0 : index
    %c0_3 = arith.constant 0 : index
    %8 = vector.load %arg2[%c0_2, %c0_3] : memref<64x32xbf16, #tpu.memory_space<vmem>>, vector<64x32xbf16>
    %cst_4 = arith.constant dense<0.000000e+00> : vector<16x32xf32>
    %9 = tpu.matmul %7, %8, %cst_4 {dimension_numbers = #tpu.dot_dimension_numbers<[1], [0], [0], [1], [0, 0, 1, 1], [], []>} : vector<16x64xbf16>, vector<64x32xbf16>, vector<16x32xf32> -> vector<16x32xf32>
    %10 = tpu.iota {dimensions = array<i32: 0>} : vector<8x8xi32>
    %11 = tpu.iota {dimensions = array<i32: 1>} : vector<8x8xi32>
    %12 = arith.cmpi sle, %11, %10 : vector<8x8xi32>
    %cst_5 = arith.constant 0.000000e+00 : f32
    %cst_6 = arith.constant -1.000000e+09 : f32
    %13 = vector.broadcast %cst_5 : f32 to vector<8x8xf32>
    %14 = vector.broadcast %cst_6 : f32 to vector<8x8xf32>
    %15 = arith.select %12, %13, %14 : vector<8x8xi1>, vector<8x8xf32>
    %c0_7 = arith.constant 0 : index
    %c0_8 = arith.constant 0 : index
    %16 = vector.load %arg1[%c0_7, %c0_8] : memref<2x8xf32, #tpu.memory_space<vmem>>, vector<2x8xf32>
    %cst_9 = arith.constant 1.000000e+00 : f32
    %17 = vector.broadcast %cst_9 : f32 to vector<2x8xf32>
    %18 = arith.subf %17, %16 : vector<2x8xf32>
    %cst_10 = arith.constant -1.000000e+09 : f32
    %19 = vector.broadcast %cst_10 : f32 to vector<2x8xf32>
    %20 = arith.mulf %18, %19 : vector<2x8xf32>
    %21 = vector.shape_cast %15 : vector<8x8xf32> to vector<1x8x8xf32>
    %22 = vector.shape_cast %20 : vector<2x8xf32> to vector<2x1x8xf32>
    %23 = vector.broadcast %21 : vector<1x8x8xf32> to vector<2x8x8xf32>
    %24 = vector.broadcast %22 : vector<2x1x8xf32> to vector<2x8x8xf32>
    %25 = arith.addf %23, %24 : vector<2x8x8xf32>
    %c0_11 = arith.constant 0 : index
    %c0_12 = arith.constant 0 : index
    %c0_13 = arith.constant 0 : index
    %26 = vector.load %arg3[%c0_11, %c0_12, %c0_13] : memref<2x1x32xf32, #tpu.memory_space<vmem>>, vector<1x1x32xf32>
    %27 = vector.shape_cast %26 : vector<1x1x32xf32> to vector<1x32xf32>
    %28 = arith.mulf %9, %9 : vector<16x32xf32>
    %cst_14 = arith.constant dense<0.000000e+00> : vector<16xf32>
    %29 = vector.multi_reduction <add>, %28, %cst_14 [1] : vector<16x32xf32> to vector<16xf32>
    %30 = vector.shape_cast %29 : vector<16xf32> to vector<16x1xf32>
    %cst_15 = arith.constant 3.200000e+01 : f32
    %31 = vector.broadcast %cst_15 : f32 to vector<16x1xf32>
    %32 = arith.divf %30, %31 : vector<16x1xf32>
    %cst_16 = arith.constant 9.99999997E-7 : f32
    %33 = vector.broadcast %cst_16 : f32 to vector<16x1xf32>
    %34 = arith.addf %32, %33 : vector<16x1xf32>
    %35 = math.rsqrt %34 : vector<16x1xf32>
    %36 = vector.broadcast %35 : vector<16x1xf32> to vector<16x32xf32>
    %37 = arith.mulf %9, %36 : vector<16x32xf32>
    %38 = vector.broadcast %27 : vector<1x32xf32> to vector<16x32xf32>
    %39 = arith.mulf %37, %38 : vector<16x32xf32>
    %40 = arith.truncf %39 : vector<16x32xf32> to vector<16x32xbf16>
    %41 = vector.shape_cast %40 : vector<16x32xbf16> to vector<1x16x32xbf16>
    %42 = vector.shape_cast %41 : vector<1x16x32xbf16> to vector<1x16x32xbf16>
    %43 = vector.broadcast %42 : vector<1x16x32xbf16> to vector<12x16x32xbf16>
    %c0_17 = arith.constant 0 : index
    %c0_18 = arith.constant 0 : index
    %c0_19 = arith.constant 0 : index
    %c0_20 = arith.constant 0 : index
    %44 = vector.load %arg4[%c0_17, %c0_18, %c0_19, %c0_20] : memref<2x12x32x8xbf16, #tpu.memory_space<vmem>>, vector<1x12x32x8xbf16>
    %45 = vector.shape_cast %44 : vector<1x12x32x8xbf16> to vector<12x32x8xbf16>
    "tpu.trace_start"() <{level = 10 : i32, message = "and,adk->ank"}> : () -> ()
    %cst_21 = arith.constant dense<0.000000e+00> : vector<12x16x8xf32>
    %46 = tpu.matmul %43, %45, %cst_21 {dimension_numbers = #tpu.dot_dimension_numbers<[2], [1], [1], [2], [0, 0, 0, 1, 1, 2], [0], [0]>} : vector<12x16x32xbf16>, vector<12x32x8xbf16>, vector<12x16x8xf32> -> vector<12x16x8xf32>
    "tpu.trace_stop"() : () -> ()
    %47 = vector.extract_strided_slice %46 {offsets = [0, 0, 0], sizes = [4, 16, 8], strides = [1, 1, 1]} : vector<12x16x8xf32> to vector<4x16x8xf32>
    %48 = vector.shape_cast %47 : vector<4x16x8xf32> to vector<8x8x8xf32>
    %49 = arith.truncf %48 : vector<8x8x8xf32> to vector<8x8x8xbf16>
    %50 = vector.extract_strided_slice %46 {offsets = [4, 0, 0], sizes = [4, 16, 8], strides = [1, 1, 1]} : vector<12x16x8xf32> to vector<4x16x8xf32>
    %51 = vector.shape_cast %50 : vector<4x16x8xf32> to vector<8x8x8xf32>
    %52 = arith.truncf %51 : vector<8x8x8xf32> to vector<8x8x8xbf16>
    %53 = vector.extract_strided_slice %46 {offsets = [8, 0, 0], sizes = [4, 16, 8], strides = [1, 1, 1]} : vector<12x16x8xf32> to vector<4x16x8xf32>
    %54 = vector.shape_cast %53 : vector<4x16x8xf32> to vector<8x8x8xf32>
    %55 = arith.truncf %54 : vector<8x8x8xf32> to vector<8x8x8xbf16>
    "tpu.trace_start"() <{level = 10 : i32, message = "gsk,gtk->gst"}> : () -> ()
    %cst_22 = arith.constant dense<0.000000e+00> : vector<8x8x8xf32>
    %56 = tpu.matmul %49, %52, %cst_22 {dimension_numbers = #tpu.dot_dimension_numbers<[2], [2], [1], [1], [0, 0, 0, 1, 1, 1], [0], [0]>} : vector<8x8x8xbf16>, vector<8x8x8xbf16>, vector<8x8x8xf32> -> vector<8x8x8xf32>
    "tpu.trace_stop"() : () -> ()
    %57 = vector.shape_cast %56 : vector<8x8x8xf32> to vector<4x2x8x8xf32>
    %58 = vector.shape_cast %25 : vector<2x8x8xf32> to vector<1x2x8x8xf32>
    %59 = vector.broadcast %58 : vector<1x2x8x8xf32> to vector<4x2x8x8xf32>
    %60 = arith.addf %57, %59 : vector<4x2x8x8xf32>
    %61 = vector.shape_cast %60 : vector<4x2x8x8xf32> to vector<8x8x8xf32>
    %cst_23 = arith.constant dense<0xFF800000> : vector<8x8xf32>
    %62 = vector.multi_reduction <maximumf>, %61, %cst_23 [2] : vector<8x8x8xf32> to vector<8x8xf32>
    %63 = vector.shape_cast %62 : vector<8x8xf32> to vector<8x8x1xf32>
    %64 = vector.broadcast %63 : vector<8x8x1xf32> to vector<8x8x8xf32>
    %65 = arith.subf %61, %64 : vector<8x8x8xf32>
    %66 = math.exp %65 : vector<8x8x8xf32>
    %cst_24 = arith.constant dense<0.000000e+00> : vector<8x8xf32>
    %67 = vector.multi_reduction <add>, %66, %cst_24 [2] : vector<8x8x8xf32> to vector<8x8xf32>
    %68 = vector.shape_cast %67 : vector<8x8xf32> to vector<8x8x1xf32>
    %69 = tpu.reciprocal %68 {approx = true} : vector<8x8x1xf32> -> vector<8x8x1xf32>
    %70 = vector.broadcast %69 : vector<8x8x1xf32> to vector<8x8x8xf32>
    %71 = arith.mulf %66, %70 : vector<8x8x8xf32>
    %72 = arith.truncf %71 : vector<8x8x8xf32> to vector<8x8x8xbf16>
    "tpu.trace_start"() <{level = 10 : i32, message = "gst,gtk->gsk"}> : () -> ()
    %cst_25 = arith.constant dense<0.000000e+00> : vector<8x8x8xf32>
    %73 = tpu.matmul %72, %55, %cst_25 {dimension_numbers = #tpu.dot_dimension_numbers<[2], [1], [1], [2], [0, 0, 0, 1, 1, 2], [0], [0]>} : vector<8x8x8xbf16>, vector<8x8x8xbf16>, vector<8x8x8xf32> -> vector<8x8x8xf32>
    "tpu.trace_stop"() : () -> ()
    %74 = vector.shape_cast %73 : vector<8x8x8xf32> to vector<4x16x8xf32>
    %75 = arith.truncf %74 : vector<4x16x8xf32> to vector<4x16x8xbf16>
    %c0_26 = arith.constant 0 : index
    %c0_27 = arith.constant 0 : index
    %c0_28 = arith.constant 0 : index
    %c0_29 = arith.constant 0 : index
    %76 = vector.load %arg5[%c0_26, %c0_27, %c0_28, %c0_29] : memref<2x4x8x32xbf16, #tpu.memory_space<vmem>>, vector<1x4x8x32xbf16>
    %77 = vector.shape_cast %76 : vector<1x4x8x32xbf16> to vector<4x8x32xbf16>
    "tpu.trace_start"() <{level = 10 : i32, message = "hnk,hkd->hnd"}> : () -> ()
    %cst_30 = arith.constant dense<0.000000e+00> : vector<4x16x32xf32>
    %78 = tpu.matmul %75, %77, %cst_30 {dimension_numbers = #tpu.dot_dimension_numbers<[2], [1], [1], [2], [0, 0, 0, 1, 1, 2], [0], [0]>} : vector<4x16x8xbf16>, vector<4x8x32xbf16>, vector<4x16x32xf32> -> vector<4x16x32xf32>
    "tpu.trace_stop"() : () -> ()
    %cst_31 = arith.constant dense<0.000000e+00> : vector<16x32xf32>
    %79 = vector.multi_reduction <add>, %78, %cst_31 [0] : vector<4x16x32xf32> to vector<16x32xf32>
    %80 = arith.addf %9, %79 : vector<16x32xf32>
    %c0_32 = arith.constant 0 : index
    %c0_33 = arith.constant 0 : index
    %c0_34 = arith.constant 0 : index
    %81 = vector.load %arg6[%c0_32, %c0_33, %c0_34] : memref<2x1x32xf32, #tpu.memory_space<vmem>>, vector<1x1x32xf32>
    %82 = vector.shape_cast %81 : vector<1x1x32xf32> to vector<1x32xf32>
    %83 = arith.mulf %80, %80 : vector<16x32xf32>
    %cst_35 = arith.constant dense<0.000000e+00> : vector<16xf32>
    %84 = vector.multi_reduction <add>, %83, %cst_35 [1] : vector<16x32xf32> to vector<16xf32>
    %85 = vector.shape_cast %84 : vector<16xf32> to vector<16x1xf32>
    %cst_36 = arith.constant 3.200000e+01 : f32
    %86 = vector.broadcast %cst_36 : f32 to vector<16x1xf32>
    %87 = arith.divf %85, %86 : vector<16x1xf32>
    %cst_37 = arith.constant 9.99999997E-7 : f32
    %88 = vector.broadcast %cst_37 : f32 to vector<16x1xf32>
    %89 = arith.addf %87, %88 : vector<16x1xf32>
    %90 = math.rsqrt %89 : vector<16x1xf32>
    %91 = vector.broadcast %90 : vector<16x1xf32> to vector<16x32xf32>
    %92 = arith.mulf %80, %91 : vector<16x32xf32>
    %93 = vector.broadcast %82 : vector<1x32xf32> to vector<16x32xf32>
    %94 = arith.mulf %92, %93 : vector<16x32xf32>
    %95 = arith.truncf %94 : vector<16x32xf32> to vector<16x32xbf16>
    %c0_38 = arith.constant 0 : index
    %c0_39 = arith.constant 0 : index
    %c0_40 = arith.constant 0 : index
    %96 = vector.load %arg7[%c0_38, %c0_39, %c0_40] : memref<2x32x64xbf16, #tpu.memory_space<vmem>>, vector<1x32x64xbf16>
    %97 = vector.shape_cast %96 : vector<1x32x64xbf16> to vector<32x64xbf16>
    %cst_41 = arith.constant dense<0.000000e+00> : vector<16x64xf32>
    %98 = tpu.matmul %95, %97, %cst_41 {dimension_numbers = #tpu.dot_dimension_numbers<[1], [0], [0], [1], [0, 0, 1, 1], [], []>} : vector<16x32xbf16>, vector<32x64xbf16>, vector<16x64xf32> -> vector<16x64xf32>
    %c0_42 = arith.constant 0 : index
    %c0_43 = arith.constant 0 : index
    %c0_44 = arith.constant 0 : index
    %99 = vector.load %arg8[%c0_42, %c0_43, %c0_44] : memref<2x32x64xbf16, #tpu.memory_space<vmem>>, vector<1x32x64xbf16>
    %100 = vector.shape_cast %99 : vector<1x32x64xbf16> to vector<32x64xbf16>
    %cst_45 = arith.constant dense<0.000000e+00> : vector<16x64xf32>
    %101 = tpu.matmul %95, %100, %cst_45 {dimension_numbers = #tpu.dot_dimension_numbers<[1], [0], [0], [1], [0, 0, 1, 1], [], []>} : vector<16x32xbf16>, vector<32x64xbf16>, vector<16x64xf32> -> vector<16x64xf32>
    %102 = arith.negf %98 : vector<16x64xf32>
    %103 = math.exp %102 : vector<16x64xf32>
    %cst_46 = arith.constant 1.000000e+00 : f32
    %104 = vector.broadcast %cst_46 : f32 to vector<16x64xf32>
    %105 = arith.addf %104, %103 : vector<16x64xf32>
    %106 = arith.divf %104, %105 : vector<16x64xf32>
    %107 = arith.mulf %98, %106 : vector<16x64xf32>
    %108 = arith.mulf %107, %101 : vector<16x64xf32>
    %109 = arith.truncf %108 : vector<16x64xf32> to vector<16x64xbf16>
    %c0_47 = arith.constant 0 : index
    %c0_48 = arith.constant 0 : index
    %c0_49 = arith.constant 0 : index
    %110 = vector.load %arg9[%c0_47, %c0_48, %c0_49] : memref<2x64x32xbf16, #tpu.memory_space<vmem>>, vector<1x64x32xbf16>
    %111 = vector.shape_cast %110 : vector<1x64x32xbf16> to vector<64x32xbf16>
    %cst_50 = arith.constant dense<0.000000e+00> : vector<16x32xf32>
    %112 = tpu.matmul %109, %111, %cst_50 {dimension_numbers = #tpu.dot_dimension_numbers<[1], [0], [0], [1], [0, 0, 1, 1], [], []>} : vector<16x64xbf16>, vector<64x32xbf16>, vector<16x32xf32> -> vector<16x32xf32>
    %113 = arith.addf %80, %112 : vector<16x32xf32>
    %c1 = arith.constant 1 : index
    %c0_51 = arith.constant 0 : index
    %c0_52 = arith.constant 0 : index
    %114 = vector.load %arg3[%c1, %c0_51, %c0_52] : memref<2x1x32xf32, #tpu.memory_space<vmem>>, vector<1x1x32xf32>
    %115 = vector.shape_cast %114 : vector<1x1x32xf32> to vector<1x32xf32>
    %116 = arith.mulf %113, %113 : vector<16x32xf32>
    %cst_53 = arith.constant dense<0.000000e+00> : vector<16xf32>
    %117 = vector.multi_reduction <add>, %116, %cst_53 [1] : vector<16x32xf32> to vector<16xf32>
    %118 = vector.shape_cast %117 : vector<16xf32> to vector<16x1xf32>
    %cst_54 = arith.constant 3.200000e+01 : f32
    %119 = vector.broadcast %cst_54 : f32 to vector<16x1xf32>
    %120 = arith.divf %118, %119 : vector<16x1xf32>
    %cst_55 = arith.constant 9.99999997E-7 : f32
    %121 = vector.broadcast %cst_55 : f32 to vector<16x1xf32>
    %122 = arith.addf %120, %121 : vector<16x1xf32>
    %123 = math.rsqrt %122 : vector<16x1xf32>
    %124 = vector.broadcast %123 : vector<16x1xf32> to vector<16x32xf32>
    %125 = arith.mulf %113, %124 : vector<16x32xf32>
    %126 = vector.broadcast %115 : vector<1x32xf32> to vector<16x32xf32>
    %127 = arith.mulf %125, %126 : vector<16x32xf32>
    %128 = arith.truncf %127 : vector<16x32xf32> to vector<16x32xbf16>
    %129 = vector.shape_cast %128 : vector<16x32xbf16> to vector<1x16x32xbf16>
    %130 = vector.shape_cast %129 : vector<1x16x32xbf16> to vector<1x16x32xbf16>
    %131 = vector.broadcast %130 : vector<1x16x32xbf16> to vector<12x16x32xbf16>
    %c1_56 = arith.constant 1 : index
    %c0_57 = arith.constant 0 : index
    %c0_58 = arith.constant 0 : index
    %c0_59 = arith.constant 0 : index
    %132 = vector.load %arg4[%c1_56, %c0_57, %c0_58, %c0_59] : memref<2x12x32x8xbf16, #tpu.memory_space<vmem>>, vector<1x12x32x8xbf16>
    %133 = vector.shape_cast %132 : vector<1x12x32x8xbf16> to vector<12x32x8xbf16>
    "tpu.trace_start"() <{level = 10 : i32, message = "and,adk->ank"}> : () -> ()
    %cst_60 = arith.constant dense<0.000000e+00> : vector<12x16x8xf32>
    %134 = tpu.matmul %131, %133, %cst_60 {dimension_numbers = #tpu.dot_dimension_numbers<[2], [1], [1], [2], [0, 0, 0, 1, 1, 2], [0], [0]>} : vector<12x16x32xbf16>, vector<12x32x8xbf16>, vector<12x16x8xf32> -> vector<12x16x8xf32>
    "tpu.trace_stop"() : () -> ()
    %135 = vector.extract_strided_slice %134 {offsets = [0, 0, 0], sizes = [4, 16, 8], strides = [1, 1, 1]} : vector<12x16x8xf32> to vector<4x16x8xf32>
    %136 = vector.shape_cast %135 : vector<4x16x8xf32> to vector<8x8x8xf32>
    %137 = arith.truncf %136 : vector<8x8x8xf32> to vector<8x8x8xbf16>
    %138 = vector.extract_strided_slice %134 {offsets = [4, 0, 0], sizes = [4, 16, 8], strides = [1, 1, 1]} : vector<12x16x8xf32> to vector<4x16x8xf32>
    %139 = vector.shape_cast %138 : vector<4x16x8xf32> to vector<8x8x8xf32>
    %140 = arith.truncf %139 : vector<8x8x8xf32> to vector<8x8x8xbf16>
    %141 = vector.extract_strided_slice %134 {offsets = [8, 0, 0], sizes = [4, 16, 8], strides = [1, 1, 1]} : vector<12x16x8xf32> to vector<4x16x8xf32>
    %142 = vector.shape_cast %141 : vector<4x16x8xf32> to vector<8x8x8xf32>
    %143 = arith.truncf %142 : vector<8x8x8xf32> to vector<8x8x8xbf16>
    "tpu.trace_start"() <{level = 10 : i32, message = "gsk,gtk->gst"}> : () -> ()
    %cst_61 = arith.constant dense<0.000000e+00> : vector<8x8x8xf32>
    %144 = tpu.matmul %137, %140, %cst_61 {dimension_numbers = #tpu.dot_dimension_numbers<[2], [2], [1], [1], [0, 0, 0, 1, 1, 1], [0], [0]>} : vector<8x8x8xbf16>, vector<8x8x8xbf16>, vector<8x8x8xf32> -> vector<8x8x8xf32>
    "tpu.trace_stop"() : () -> ()
    %145 = vector.shape_cast %144 : vector<8x8x8xf32> to vector<4x2x8x8xf32>
    %146 = vector.shape_cast %25 : vector<2x8x8xf32> to vector<1x2x8x8xf32>
    %147 = vector.broadcast %146 : vector<1x2x8x8xf32> to vector<4x2x8x8xf32>
    %148 = arith.addf %145, %147 : vector<4x2x8x8xf32>
    %149 = vector.shape_cast %148 : vector<4x2x8x8xf32> to vector<8x8x8xf32>
    %cst_62 = arith.constant dense<0xFF800000> : vector<8x8xf32>
    %150 = vector.multi_reduction <maximumf>, %149, %cst_62 [2] : vector<8x8x8xf32> to vector<8x8xf32>
    %151 = vector.shape_cast %150 : vector<8x8xf32> to vector<8x8x1xf32>
    %152 = vector.broadcast %151 : vector<8x8x1xf32> to vector<8x8x8xf32>
    %153 = arith.subf %149, %152 : vector<8x8x8xf32>
    %154 = math.exp %153 : vector<8x8x8xf32>
    %cst_63 = arith.constant dense<0.000000e+00> : vector<8x8xf32>
    %155 = vector.multi_reduction <add>, %154, %cst_63 [2] : vector<8x8x8xf32> to vector<8x8xf32>
    %156 = vector.shape_cast %155 : vector<8x8xf32> to vector<8x8x1xf32>
    %157 = tpu.reciprocal %156 {approx = true} : vector<8x8x1xf32> -> vector<8x8x1xf32>
    %158 = vector.broadcast %157 : vector<8x8x1xf32> to vector<8x8x8xf32>
    %159 = arith.mulf %154, %158 : vector<8x8x8xf32>
    %160 = arith.truncf %159 : vector<8x8x8xf32> to vector<8x8x8xbf16>
    "tpu.trace_start"() <{level = 10 : i32, message = "gst,gtk->gsk"}> : () -> ()
    %cst_64 = arith.constant dense<0.000000e+00> : vector<8x8x8xf32>
    %161 = tpu.matmul %160, %143, %cst_64 {dimension_numbers = #tpu.dot_dimension_numbers<[2], [1], [1], [2], [0, 0, 0, 1, 1, 2], [0], [0]>} : vector<8x8x8xbf16>, vector<8x8x8xbf16>, vector<8x8x8xf32> -> vector<8x8x8xf32>
    "tpu.trace_stop"() : () -> ()
    %162 = vector.shape_cast %161 : vector<8x8x8xf32> to vector<4x16x8xf32>
    %163 = arith.truncf %162 : vector<4x16x8xf32> to vector<4x16x8xbf16>
    %c1_65 = arith.constant 1 : index
    %c0_66 = arith.constant 0 : index
    %c0_67 = arith.constant 0 : index
    %c0_68 = arith.constant 0 : index
    %164 = vector.load %arg5[%c1_65, %c0_66, %c0_67, %c0_68] : memref<2x4x8x32xbf16, #tpu.memory_space<vmem>>, vector<1x4x8x32xbf16>
    %165 = vector.shape_cast %164 : vector<1x4x8x32xbf16> to vector<4x8x32xbf16>
    "tpu.trace_start"() <{level = 10 : i32, message = "hnk,hkd->hnd"}> : () -> ()
    %cst_69 = arith.constant dense<0.000000e+00> : vector<4x16x32xf32>
    %166 = tpu.matmul %163, %165, %cst_69 {dimension_numbers = #tpu.dot_dimension_numbers<[2], [1], [1], [2], [0, 0, 0, 1, 1, 2], [0], [0]>} : vector<4x16x8xbf16>, vector<4x8x32xbf16>, vector<4x16x32xf32> -> vector<4x16x32xf32>
    "tpu.trace_stop"() : () -> ()
    %cst_70 = arith.constant dense<0.000000e+00> : vector<16x32xf32>
    %167 = vector.multi_reduction <add>, %166, %cst_70 [0] : vector<4x16x32xf32> to vector<16x32xf32>
    %168 = arith.addf %113, %167 : vector<16x32xf32>
    %c1_71 = arith.constant 1 : index
    %c0_72 = arith.constant 0 : index
    %c0_73 = arith.constant 0 : index
    %169 = vector.load %arg6[%c1_71, %c0_72, %c0_73] : memref<2x1x32xf32, #tpu.memory_space<vmem>>, vector<1x1x32xf32>
    %170 = vector.shape_cast %169 : vector<1x1x32xf32> to vector<1x32xf32>
    %171 = arith.mulf %168, %168 : vector<16x32xf32>
    %cst_74 = arith.constant dense<0.000000e+00> : vector<16xf32>
    %172 = vector.multi_reduction <add>, %171, %cst_74 [1] : vector<16x32xf32> to vector<16xf32>
    %173 = vector.shape_cast %172 : vector<16xf32> to vector<16x1xf32>
    %cst_75 = arith.constant 3.200000e+01 : f32
    %174 = vector.broadcast %cst_75 : f32 to vector<16x1xf32>
    %175 = arith.divf %173, %174 : vector<16x1xf32>
    %cst_76 = arith.constant 9.99999997E-7 : f32
    %176 = vector.broadcast %cst_76 : f32 to vector<16x1xf32>
    %177 = arith.addf %175, %176 : vector<16x1xf32>
    %178 = math.rsqrt %177 : vector<16x1xf32>
    %179 = vector.broadcast %178 : vector<16x1xf32> to vector<16x32xf32>
    %180 = arith.mulf %168, %179 : vector<16x32xf32>
    %181 = vector.broadcast %170 : vector<1x32xf32> to vector<16x32xf32>
    %182 = arith.mulf %180, %181 : vector<16x32xf32>
    %183 = arith.truncf %182 : vector<16x32xf32> to vector<16x32xbf16>
    %c1_77 = arith.constant 1 : index
    %c0_78 = arith.constant 0 : index
    %c0_79 = arith.constant 0 : index
    %184 = vector.load %arg7[%c1_77, %c0_78, %c0_79] : memref<2x32x64xbf16, #tpu.memory_space<vmem>>, vector<1x32x64xbf16>
    %185 = vector.shape_cast %184 : vector<1x32x64xbf16> to vector<32x64xbf16>
    %cst_80 = arith.constant dense<0.000000e+00> : vector<16x64xf32>
    %186 = tpu.matmul %183, %185, %cst_80 {dimension_numbers = #tpu.dot_dimension_numbers<[1], [0], [0], [1], [0, 0, 1, 1], [], []>} : vector<16x32xbf16>, vector<32x64xbf16>, vector<16x64xf32> -> vector<16x64xf32>
    %c1_81 = arith.constant 1 : index
    %c0_82 = arith.constant 0 : index
    %c0_83 = arith.constant 0 : index
    %187 = vector.load %arg8[%c1_81, %c0_82, %c0_83] : memref<2x32x64xbf16, #tpu.memory_space<vmem>>, vector<1x32x64xbf16>
    %188 = vector.shape_cast %187 : vector<1x32x64xbf16> to vector<32x64xbf16>
    %cst_84 = arith.constant dense<0.000000e+00> : vector<16x64xf32>
    %189 = tpu.matmul %183, %188, %cst_84 {dimension_numbers = #tpu.dot_dimension_numbers<[1], [0], [0], [1], [0, 0, 1, 1], [], []>} : vector<16x32xbf16>, vector<32x64xbf16>, vector<16x64xf32> -> vector<16x64xf32>
    %190 = arith.negf %186 : vector<16x64xf32>
    %191 = math.exp %190 : vector<16x64xf32>
    %cst_85 = arith.constant 1.000000e+00 : f32
    %192 = vector.broadcast %cst_85 : f32 to vector<16x64xf32>
    %193 = arith.addf %192, %191 : vector<16x64xf32>
    %194 = arith.divf %192, %193 : vector<16x64xf32>
    %195 = arith.mulf %186, %194 : vector<16x64xf32>
    %196 = arith.mulf %195, %189 : vector<16x64xf32>
    %197 = arith.truncf %196 : vector<16x64xf32> to vector<16x64xbf16>
    %c1_86 = arith.constant 1 : index
    %c0_87 = arith.constant 0 : index
    %c0_88 = arith.constant 0 : index
    %198 = vector.load %arg9[%c1_86, %c0_87, %c0_88] : memref<2x64x32xbf16, #tpu.memory_space<vmem>>, vector<1x64x32xbf16>
    %199 = vector.shape_cast %198 : vector<1x64x32xbf16> to vector<64x32xbf16>
    %cst_89 = arith.constant dense<0.000000e+00> : vector<16x32xf32>
    %200 = tpu.matmul %197, %199, %cst_89 {dimension_numbers = #tpu.dot_dimension_numbers<[1], [0], [0], [1], [0, 0, 1, 1], [], []>} : vector<16x64xbf16>, vector<64x32xbf16>, vector<16x32xf32> -> vector<16x32xf32>
    %201 = arith.addf %168, %200 : vector<16x32xf32>
    %202 = vector.shape_cast %201 : vector<16x32xf32> to vector<2x8x32xf32>
    %203 = vector.extract_strided_slice %202 {offsets = [0, 0, 0], sizes = [2, 1, 32], strides = [1, 1, 1]} : vector<2x8x32xf32> to vector<2x1x32xf32>
    %204 = vector.shape_cast %203 : vector<2x1x32xf32> to vector<2x32xf32>
    %c0_90 = arith.constant 0 : index
    %c0_91 = arith.constant 0 : index
    %205 = vector.load %arg10[%c0_90, %c0_91] : memref<1x32xf32, #tpu.memory_space<vmem>>, vector<1x32xf32>
    %206 = arith.mulf %204, %204 : vector<2x32xf32>
    %cst_92 = arith.constant dense<0.000000e+00> : vector<2xf32>
    %207 = vector.multi_reduction <add>, %206, %cst_92 [1] : vector<2x32xf32> to vector<2xf32>
    %208 = vector.shape_cast %207 : vector<2xf32> to vector<2x1xf32>
    %cst_93 = arith.constant 3.200000e+01 : f32
    %209 = vector.broadcast %cst_93 : f32 to vector<2x1xf32>
    %210 = arith.divf %208, %209 : vector<2x1xf32>
    %cst_94 = arith.constant 9.99999997E-7 : f32
    %211 = vector.broadcast %cst_94 : f32 to vector<2x1xf32>
    %212 = arith.addf %210, %211 : vector<2x1xf32>
    %213 = math.rsqrt %212 : vector<2x1xf32>
    %214 = vector.broadcast %213 : vector<2x1xf32> to vector<2x32xf32>
    %215 = arith.mulf %204, %214 : vector<2x32xf32>
    %216 = vector.broadcast %205 : vector<1x32xf32> to vector<2x32xf32>
    %217 = arith.mulf %215, %216 : vector<2x32xf32>
    %218 = arith.truncf %217 : vector<2x32xf32> to vector<2x32xbf16>
    %c0_95 = arith.constant 0 : index
    %c0_96 = arith.constant 0 : index
    %219 = vector.load %arg11[%c0_95, %c0_96] : memref<32x2xbf16, #tpu.memory_space<vmem>>, vector<32x2xbf16>
    %cst_97 = arith.constant dense<0.000000e+00> : vector<2x2xf32>
    %220 = tpu.matmul %218, %219, %cst_97 {dimension_numbers = #tpu.dot_dimension_numbers<[1], [0], [0], [1], [0, 0, 1, 1], [], []>} : vector<2x32xbf16>, vector<32x2xbf16>, vector<2x2xf32> -> vector<2x2xf32>
    %c0_98 = arith.constant 0 : index
    %c0_99 = arith.constant 0 : index
    %221 = vector.load %arg12[%c0_98, %c0_99] : memref<1x2xf32, #tpu.memory_space<vmem>>, vector<1x2xf32>
    %222 = vector.broadcast %221 : vector<1x2xf32> to vector<2x2xf32>
    %223 = arith.addf %220, %222 : vector<2x2xf32>
    %c0_100 = arith.constant 0 : index
    %c0_101 = arith.constant 0 : index
    %224 = vector.load %arg13[%c0_100, %c0_101] : memref<2x2xf32, #tpu.memory_space<vmem>>, vector<2x2xf32>
    tpu.vector_store %arg13[%c0_100, %c0_101], %223 {strides = array<i32>} : memref<2x2xf32, #tpu.memory_space<vmem>>, vector<2x2xf32>,
    return
  }
}

</mosaic_0001>

<bundles_post_ra>
// kernel: tpu_custom_call.1
= control target key start
LH: loop header
LB: loop body
LE: loop exit
PB: predicated region body
PF: predicated region fallthrough
CT: control target
= control target key end

     0   :  { %v5475_v1 = vmov 0   ;;  %v5476_v2 = vmov 0.0   ;;  %vm5477_vm0 = vmmov 0   ;;  %s6460_s0 = inlined_call_operand.vmem [shape: s32[16,1], index: 0, kind: input, shape index: {}]   ;;  %s6461_s1 = inlined_call_operand.vmem [shape: f32[2,8], index: 1, kind: input, shape index: {}]   ;;  %s6462_s2 = inlined_call_operand.vmem [shape: bf16[64,32], index: 2, kind: input, shape index: {}]   ;;  %s6463_s3 = inlined_call_operand.vmem [shape: f32[2,1,32], index: 3, kind: input, shape index: {}]   ;;  %s6464_s4 = inlined_call_operand.vmem [shape: bf16[2,12,32,8], index: 4, kind: input, shape index: {}]   ;;  %s6465_s5 = inlined_call_operand.vmem [shape: bf16[2,4,8,32], index: 5, kind: input, shape index: {}]   ;;  %s6466_s6 = inlined_call_operand.vmem [shape: f32[2,1,32], index: 6, kind: input, shape index: {}]   ;;  %s6467_s7 = inlined_call_operand.vmem [shape: bf16[2,32,64], index: 7, kind: input, shape index: {}]   ;;  %s6468_s8 = inlined_call_operand.vmem [shape: bf16[2,32,64], index: 8, kind: input, shape index: {}]   ;;  %s6469_s9 = inlined_call_operand.vmem [shape: bf16[2,64,32], index: 9, kind: input, shape index: {}]   ;;  %s6470_s10 = inlined_call_operand.vmem [shape: f32[1,32], index: 10, kind: input, shape index: {}]   ;;  %s6471_s11 = inlined_call_operand.vmem [shape: bf16[32,2], index: 11, kind: input, shape index: {}]   ;;  %s6472_s12 = inlined_call_operand.vmem [shape: f32[1,2], index: 12, kind: input, shape index: {}]   ;;  %s6473_s13 = inlined_call_operand.hbm [shape: f32[2,2], index: 13, kind: output, shape index: {}]  }
   0x1   :  { %v48_v0 = vld [vmem:[%s6460_s0] sm:$0xff]  ;;  %5284 = vset.pattern.permute.xlu0 %v5475_v1  ;;  %4770 = vmatprep.subr.bf16.mxu0 %v5476_v2  ;;  %v5285_v3 = vld [vmem:[%s6462_s2 + $0x18] sm:$0xff]   ;;  %v49_v4 = vld [vmem:[%s6460_s0 + $0x8] sm:$0xff] }
   0x2   :  { %51 = vperm.xlu0 %5284, %v48_v0   ;;  %4782 = vmatprep.subr.bf16.mxu1 %v5476_v2  ;;  %v5286_v5 = vld [vmem:[%s6462_s2 + $0x10] sm:$0xff]   ;;  %v5287_v6 = vld [vmem:[%s6462_s2 + $0x8] sm:$0xff]   ;;  %v5288_v7 = vld [vmem:[%s6462_s2] sm:$0xff]  }
   0x3   :  { %4771 = vmatpush3.bf16.msra.mxu0 %v5285_v3  ;;  %4778 = vmatprep.mubr.msk.bf16.mxu0 %vm5477_vm0, %v5476_v2 }
   0x4   :  { %4772 = vmatprep.subr.bf16.mxu0 %v5476_v2  ;;  %4786 = vmatprep.mubr.msk.bf16.mxu1 %vm5477_vm0, %v5476_v2 }
   0x6   :  { %54 = vperm.xlu0 %5284, %v49_v4  }
   0x7   :  { %4773 = vmatpush3.bf16.msra.mxu0 %v5286_v5 }
   0x8   :  { %4774 = vmatprep.subr.bf16.mxu0 %v5476_v2 }
   0xb   :  { %4775 = vmatpush3.bf16.msra.mxu0 %v5287_v6 }
   0xc   :  { %4776 = vmatprep.subr.bf16.mxu0 %v5476_v2 }
   0xf   :  { %4777 = vmatpush3.bf16.msra.mxu0 %v5288_v7 }
  0x10   :  { %4798 = vmatprep.subr.bf16.mxu0 %v5476_v2 }
  0x11   :  { %18 = vsyncpa [#allocation3], 0  ;;  %v46_v8 = vlaneseq  ;;  %vm93_vm3 = vcmask 523264   ;;  %vm183_vm4 = vcmask 261120   ;;  %v5289_v23 = vld [vmem:[%s6464_s4 + $0x8] sm:$0xff]   ;;  %v5291_v25 = vld [vmem:[%s6464_s4] sm:$0xff]  }
  0x12   :  { %v5290_v24 = vld [vmem:[%s6464_s4 + $0x28] sm:$0xff]   ;;  %4783 = vmatpush3.bf16.msra.mxu1 %v5289_v23  ;;  %v5292_v26 = vld [vmem:[%s6464_s4 + $0x20] sm:$0xff]   ;;  %v5293_v40 = vld [vmem:[%s6464_s4 + $0x18] sm:$0xff]   ;;  %vm919_vm5 = vcmask 64512   ;;  %vm1395_vm6 = vcmask 1043456   ;;  %vm4251_vm8 = vcmask 1041409  }
  0x13   :  { %v5580_v9 = vand.u32 127, %v46_v8  ;;  %4784 = vmatprep.subr.bf16.mxu1 %v5476_v2  ;;  %v4371_v36 = vld [vmem:[%s6463_s3] ss:$0 sm:$0xff]  ;;  %v5294_v41 = vld [vmem:[%s6464_s4 + $0x48] sm:$0xff]   ;;  %v5295_v43 = vld [vmem:[%s6464_s4 + $0x10] sm:$0xff]   ;;  %vm4254_vm9 = vcmask 254976  }
  0x14   :  { %v5296_v44 = vld [vmem:[%s6464_s4 + $0x40] sm:$0xff]   ;;  %v5297_v45 = vld [vmem:[%s6464_s4 + $0x38] sm:$0xff]   ;;  %v5298_v46 = vld [vmem:[%s6464_s4 + $0x68] sm:$0xff]   ;;  %vm4350_vm10 = vcmask 9216  }
  0x15   :  { %v5299_v47 = vld [vmem:[%s6464_s4 + $0x30] sm:$0xff]   ;;  %v5300_v48 = vld [vmem:[%s6464_s4 + $0x60] sm:$0xff]   ;;  %v5301_v49 = vld [vmem:[%s6464_s4 + $0x58] sm:$0xff]  }
  0x16   :  { %4785 = vmatpush3.bf16.msra.mxu1 %v5291_v25  ;;  %v5302_v50 = vld [vmem:[%s6464_s4 + $0x88] sm:$0xff]   ;;  %v5303_v51 = vld [vmem:[%s6464_s4 + $0x50] sm:$0xff]   ;;  %v5304_v52 = vld [vmem:[%s6464_s4 + $0x80] sm:$0xff]  }
  0x17   :  { %4790 = vmatprep.subr.bf16.mxu1 %v5476_v2  ;;  %v5305_v53 = vld [vmem:[%s6464_s4 + $0x78] sm:$0xff]   ;;  %v5306_v54 = vld [vmem:[%s6464_s4 + $0xa8] sm:$0xff]   ;;  %v5307_v55 = vld [vmem:[%s6464_s4 + $0x70] sm:$0xff]  }
  0x18   :  { %v5308_v56 = vld [vmem:[%s6464_s4 + $0xa0] sm:$0xff]   ;;  %v5309_v57 = vld [vmem:[%s6464_s4 + $0x98] sm:$0xff]   ;;  %v5310_v58 = vld [vmem:[%s6464_s4 + $0x90] sm:$0xff]  }
  0x19   :  { %v5311_v59 = vld [vmem:[%s6464_s4 + $0xb8] sm:$0xff]   ;;  %v5312_v60 = vld [vmem:[%s6464_s4 + $0xb0] sm:$0xff]  }
  0x7d   :  { %v52_v10 = vpop.permute.xlu0 %51 }
  0x7e   :  { %vm56_vm1 = vcmp.eq.s32.totalorder %v52_v10, %v5580_v9 }
  0x7f   :  { %v58_v12 = vsel %vm56_vm1, 1.0, %v5476_v2 }
  0x81   :  { %v55_v11 = vpop.permute.xlu0 %54 }
  0x82   :  { %vm57_vm2 = vcmp.eq.s32.totalorder %v55_v11, %v5580_v9 }
  0x83   :  { %v59_v13 = vsel %vm57_vm2, 1.0, %v5476_v2 }
  0x84   :  { %v60_v14 = vpack.c.bf16 %v59_v13, %v58_v12 }
  0x86   :  { %4779 = vmatmul.mubr.msk.bf16.vlgmr.msra.gmra.mxu0 %vm93_vm3, %v60_v14 }
  0x87   :  { %4802 = vmatprep.mubr.msk.bf16.mxu0 %vm5477_vm0, %v5476_v2  ;;  %4799 = vmatpush3.bf16.msra.mxu0 %v5290_v24 }
  0x88   :  { %4800 = vmatprep.subr.bf16.mxu0 %v5476_v2 }
  0x8b   :  { %4801 = vmatpush3.bf16.msra.mxu0 %v5292_v26 }
  0x8c   :  { %4814 = vmatprep.subr.bf16.mxu0 %v5476_v2 }
 0x146   :  { %v5589_v15 = vpop.f32.mrf.mxu0 }
 0x147   :  { %v181_v16 = vmul.f32 %v5589_v15, %v5589_v15 }
 0x148   :  { %v4780_v17 = vpop.f32.mrf.mxu0 }
 0x149   :  { %v184_v18 = vsel %vm183_vm4, %v181_v16, 0.0 }
 0x14a   :  { %185 = vadd.xlane.f32.xlu1 %v184_v18  ;;  %v5594_v19 = vpop.f32.mrf.mxu0 }
 0x14b   :  { %v182_v20 = vmul.f32 %v5594_v19, %v5594_v19 }
 0x14c   :  { %v4781_v21 = vpop.f32.mrf.mxu0 }
 0x14d   :  { %v187_v22 = vsel %vm183_vm4, %v182_v20, 0.0 }
 0x14e   :  { %188 = vadd.xlane.f32.xlu1 %v187_v22 }
 0x1d3   :  { %v186_v27 = vpop.xlane.xlu1 %185 }
 0x1d4   :  { %v191_v28 = vmul.f32 0.03125, %v186_v27 }
 0x1d6   :  { %v193_v29 = vadd.f32 1e-06, %v191_v28 }
 0x1d7   :  { %v189_v30 = vpop.xlane.xlu1 %188 }
 0x1d8   :  { %5355 = vrsqrt.f32 %v193_v29  ;;  %v192_v31 = vmul.f32 0.03125, %v189_v30 }
 0x1da   :  { %v194_v32 = vadd.f32 1e-06, %v192_v31 }
 0x1dc   :  { %5357 = vrsqrt.f32 %v194_v32 }
 0x1e5   :  { %v5356_v33 = vpop.eup %5355 }
 0x1e6   :  { %v197_v34 = vmul.f32 %v5356_v33, %v5589_v15 }
 0x1e8   :  { %v205_v38 = vmul.f32 %v4371_v36, %v197_v34 }
 0x1e9   :  { %v5358_v35 = vpop.eup %5357 }
 0x1ea   :  { %v198_v37 = vmul.f32 %v5358_v35, %v5594_v19 }
 0x1ec   :  { %v206_v39 = vmul.f32 %v4371_v36, %v198_v37 }
 0x1ee   :  { %v5626_v42 = vpack.c.bf16 %v206_v39, %v205_v38 }
 0x1f0   :  { %4787 = vmatmul.mubr.msk.bf16.vlgmr.msra.gmra.mxu1 %vm183_vm4, %v5626_v42  ;;  %4803 = vmatmul.mubr.msk.bf16.vlgmr.msra.gmra.mxu0 %vm183_vm4, %v5626_v42 }
 0x1f1   :  { %4791 = vmatpush3.bf16.msra.mxu1 %v5293_v40  ;;  %4815 = vmatpush3.bf16.msra.mxu0 %v5294_v41 }
 0x1f2   :  { %4792 = vmatprep.subr.bf16.mxu1 %v5476_v2  ;;  %4816 = vmatprep.subr.bf16.mxu0 %v5476_v2 }
 0x1f3   :  { %4794 = vmatprep.mubr.msk.bf16.mxu1 %vm5477_vm0, %v5476_v2  ;;  %4818 = vmatprep.mubr.msk.bf16.mxu0 %vm5477_vm0, %v5476_v2 }
 0x1f5   :  { %4793 = vmatpush3.bf16.msra.mxu1 %v5295_v43  ;;  %4817 = vmatpush3.bf16.msra.mxu0 %v5296_v44 }
 0x1f6   :  { %4806 = vmatprep.subr.bf16.mxu1 %v5476_v2  ;;  %4830 = vmatprep.subr.bf16.mxu0 %v5476_v2 }
 0x1f8   :  { %4795 = vmatmul.mubr.msk.bf16.vlgmr.msra.gmra.mxu1 %vm183_vm4, %v5626_v42  ;;  %4819 = vmatmul.mubr.msk.bf16.vlgmr.msra.gmra.mxu0 %vm183_vm4, %v5626_v42 }
 0x1f9   :  { %4807 = vmatpush3.bf16.msra.mxu1 %v5297_v45  ;;  %4831 = vmatpush3.bf16.msra.mxu0 %v5298_v46 }
 0x1fa   :  { %4808 = vmatprep.subr.bf16.mxu1 %v5476_v2  ;;  %4832 = vmatprep.subr.bf16.mxu0 %v5476_v2 }
 0x1fb   :  { %4810 = vmatprep.mubr.msk.bf16.mxu1 %vm5477_vm0, %v5476_v2  ;;  %4834 = vmatprep.mubr.msk.bf16.mxu0 %vm5477_vm0, %v5476_v2 }
 0x1fd   :  { %4809 = vmatpush3.bf16.msra.mxu1 %v5299_v47  ;;  %4833 = vmatpush3.bf16.msra.mxu0 %v5300_v48 }
 0x1fe   :  { %4822 = vmatprep.subr.bf16.mxu1 %v5476_v2  ;;  %4846 = vmatprep.subr.bf16.mxu0 %v5476_v2 }
 0x200   :  { %4811 = vmatmul.mubr.msk.bf16.vlgmr.msra.gmra.mxu1 %vm183_vm4, %v5626_v42  ;;  %4835 = vmatmul.mubr.msk.bf16.vlgmr.msra.gmra.mxu0 %vm183_vm4, %v5626_v42 }
 0x201   :  { %4823 = vmatpush3.bf16.msra.mxu1 %v5301_v49  ;;  %4847 = vmatpush3.bf16.msra.mxu0 %v5302_v50 }
 0x202   :  { %4824 = vmatprep.subr.bf16.mxu1 %v5476_v2  ;;  %4848 = vmatprep.subr.bf16.mxu0 %v5476_v2 }
 0x203   :  { %4826 = vmatprep.mubr.msk.bf16.mxu1 %vm5477_vm0, %v5476_v2  ;;  %4850 = vmatprep.mubr.msk.bf16.mxu0 %vm5477_vm0, %v5476_v2 }
 0x205   :  { %4825 = vmatpush3.bf16.msra.mxu1 %v5303_v51  ;;  %4849 = vmatpush3.bf16.msra.mxu0 %v5304_v52 }
 0x206   :  { %4838 = vmatprep.subr.bf16.mxu1 %v5476_v2  ;;  %4862 = vmatprep.subr.bf16.mxu0 %v5476_v2 }
 0x208   :  { %4827 = vmatmul.mubr.msk.bf16.vlgmr.msra.gmra.mxu1 %vm183_vm4, %v5626_v42  ;;  %4851 = vmatmul.mubr.msk.bf16.vlgmr.msra.gmra.mxu0 %vm183_vm4, %v5626_v42 }
 0x209   :  { %4839 = vmatpush3.bf16.msra.mxu1 %v5305_v53  ;;  %4863 = vmatpush3.bf16.msra.mxu0 %v5306_v54 }
 0x20a   :  { %4840 = vmatprep.subr.bf16.mxu1 %v5476_v2  ;;  %4864 = vmatprep.subr.bf16.mxu0 %v5476_v2 }
 0x20b   :  { %4842 = vmatprep.mubr.msk.bf16.mxu1 %vm5477_vm0, %v5476_v2  ;;  %4866 = vmatprep.mubr.msk.bf16.mxu0 %vm5477_vm0, %v5476_v2 }
 0x20d   :  { %4841 = vmatpush3.bf16.msra.mxu1 %v5307_v55  ;;  %4865 = vmatpush3.bf16.msra.mxu0 %v5308_v56 }
 0x20e   :  { %4854 = vmatprep.subr.bf16.mxu1 %v5476_v2  ;;  %4878 = vmatprep.subr.bf16.mxu0 %v5476_v2 }
 0x210   :  { %4843 = vmatmul.mubr.msk.bf16.vlgmr.msra.gmra.mxu1 %vm183_vm4, %v5626_v42  ;;  %4867 = vmatmul.mubr.msk.bf16.vlgmr.msra.gmra.mxu0 %vm183_vm4, %v5626_v42 }
 0x211   :  { %4855 = vmatpush3.bf16.msra.mxu1 %v5309_v57  ;;  %4858 = vmatprep.mubr.msk.bf16.mxu1 %vm5477_vm0, %v5476_v2 }
 0x212   :  { %4856 = vmatprep.subr.bf16.mxu1 %v5476_v2  ;;  %4880 = vmatprep.mubr.msk.bf16.mxu0 %vm5477_vm0, %v5476_v2 }
 0x215   :  { %4857 = vmatpush3.bf16.msra.mxu1 %v5310_v58 }
 0x216   :  { %4870 = vmatprep.subr.bf16.mxu1 %v5476_v2 }
 0x218   :  { %4859 = vmatmul.mubr.msk.bf16.vlgmr.msra.gmra.mxu1 %vm183_vm4, %v5626_v42 }
 0x219   :  { %4871 = vmatpush3.bf16.msra.mxu1 %v5311_v59  ;;  %4874 = vmatprep.mubr.msk.bf16.mxu1 %vm5477_vm0, %v5476_v2 }
 0x21a   :  { %4872 = vmatprep.subr.bf16.mxu1 %v5476_v2 }
 0x21d   :  { %4873 = vmatpush3.bf16.msra.mxu1 %v5312_v60 }
 0x21e   :  { %4884 = vmatprep.subr.bf16.mxu1 %v5476_v2 }
 0x220   :  { %4875 = vmatmul.mubr.msk.bf16.vlgmr.msra.gmra.mxu1 %vm183_vm4, %v5626_v42 }
 0x221   :  { %4886 = vmatprep.mubr.msk.bf16.mxu1 %vm5477_vm0, %v5476_v2 }
 0x2b0   :  { %v305_v61 = vpop.f32.mrf.mxu1  ;;  %v5750_v62 = vpop.f32.mrf.mxu0 }
 0x2b1   :  { %v895_v24 = vpack.c.bf16 %v305_v61, %v305_v61  ;;  %v899_v60 = vpack.c.bf16 %v5750_v62, %v5750_v62 }
 0x2b2   :  { %v4788_v63 = vpop.f32.mrf.mxu1  ;;  %v4804_v0 = vpop.f32.mrf.mxu0 }
 0x2b4   :  { %v308_v1 = vpop.f32.mrf.mxu1  ;;  %v5752_v3 = vpop.f32.mrf.mxu0 }
 0x2b5   :  { %v896_v29 = vpack.c.bf16 %v308_v1, %v308_v1 }
 0x2b6   :  { %v4789_v4 = vpop.f32.mrf.mxu1  ;;  %v4805_v5 = vpop.f32.mrf.mxu0 }
 0x2b7   :  { %v900_v4 = vpack.c.bf16 %v5752_v3, %v5752_v3 }
 0x2b8   :  { %v358_v6 = vpop.f32.mrf.mxu1  ;;  %v517_v7 = vpop.f32.mrf.mxu0 }
 0x2b9   :  { %v903_v10 = vpack.c.bf16 %v517_v7, %v517_v7  ;;  %v897_v47 = vpack.c.bf16 %v358_v6, %v358_v6 }
 0x2ba   :  { %v4796_v11 = vpop.f32.mrf.mxu1  ;;  %v4820_v12 = vpop.f32.mrf.mxu0 }
 0x2bb   :  { %v924_v13 = vsel %vm919_vm5, %v903_v10, 0 }
 0x2bc   :  { %v361_v14 = vpop.f32.mrf.mxu1  ;;  %v520_v16 = vpop.f32.mrf.mxu0  ;;  %4879 = vmatpush3.bf16.xpose.msra.mxu0 %v924_v13 }
 0x2bd   :  { %v904_v17 = vpack.c.bf16 %v520_v16, %v520_v16  ;;  %4890 = vmatprep.subr.bf16.mxu0 %v5476_v2  ;;  %v898_v54 = vpack.c.bf16 %v361_v14, %v361_v14 }
 0x2be   :  { %v4797_v18 = vpop.f32.mrf.mxu1  ;;  %v4821_v20 = vpop.f32.mrf.mxu0 }
 0x2bf   :  { %v970_v21 = vsel %vm919_vm5, %v904_v17, 0  ;;  %v5478_v18 = vmov 1966171168  }
 0x2c0   :  { %v5757_v22 = vpop.f32.mrf.mxu1  ;;  %v623_v23 = vpop.f32.mrf.mxu0  ;;  %4885 = vmatpush3.bf16.xpose.msra.mxu1 %v970_v21  ;;  %v147_v20 = vunpack.c.l.s4 %v5478_v18  ;;  %v142_v21 = vld [vmem:[%s6461_s1] sm:$0x3] }
 0x2c1   :  { %4896 = vmatprep.subr.bf16.mxu1 %v5476_v2  ;;  %v907_v43 = vpack.c.bf16 %v623_v23, %v623_v23  ;;  %v901_v10 = vpack.c.bf16 %v5757_v22, %v5757_v22  ;;  %v143_v22 = vsub.f32 1.0, %v142_v21 }
 0x2c2   :  { %v4812_v25 = vpop.f32.mrf.mxu1  ;;  %v4836_v26 = vpop.f32.mrf.mxu0  ;;  %v148_v23 = vunpack.c.0.s8 %v147_v20 }
 0x2c3   :  { %4881 = vmatmul.mubr.msk.bf16.vlgmr.msra.gmra.mxu0 %vm919_vm5, %v895_v24  ;;  %v1108_v50 = vsel %vm919_vm5, %v907_v43, 0  ;;  %v139_v24 = vshrl.u32 %v46_v8, 7  ;;  %v144_v25 = vmul.f32 -1e+09, %v143_v22 }
 0x2c4   :  { %v5761_v27 = vpop.f32.mrf.mxu1  ;;  %v626_v28 = vpop.f32.mrf.mxu0  ;;  %4892 = vmatprep.mubr.msk.bf16.mxu0 %vm5477_vm0, %v5476_v2 }
 0x2c5   :  { %v908_v51 = vpack.c.bf16 %v626_v28, %v626_v28  ;;  %v902_v14 = vpack.c.bf16 %v5761_v27, %v5761_v27  ;;  %v151_v26 = vsub.s32 %v148_v23, %v139_v24  ;;  %vm140_vm7 = vcmp.le.s32.totalorder %v5580_v9, %v139_v24 }
 0x2c6   :  { %v4813_v30 = vpop.f32.mrf.mxu1  ;;  %v4837_v31 = vpop.f32.mrf.mxu0 }
 0x2c7   :  { %4887 = vmatmul.mubr.msk.bf16.vlgmr.msra.gmra.mxu1 %vm919_vm5, %v896_v29  ;;  %v1154_v57 = vsel %vm919_vm5, %v908_v51, 0  ;;  %v152_v27 = vrot.slane %v144_v25, %v151_v26  ;;  %v170_v30 = vsub.s32 0, %v139_v24 }
 0x2c8   :  { %v570_v32 = vpop.f32.mrf.mxu1  ;;  %v729_v33 = vpop.f32.mrf.mxu0  ;;  %4898 = vmatprep.mubr.msk.bf16.mxu1 %vm5477_vm0, %v5476_v2 }
 0x2c9   :  { %v905_v34 = vpack.c.bf16 %v570_v32, %v570_v32  ;;  %v911_v5 = vpack.c.bf16 %v729_v33, %v729_v33  ;;  %v153_v28 = vcombine.high %v152_v27, %v152_v27  ;;  %v160_v29 = vrot.slane %v152_v27, %v151_v26 }
 0x2ca   :  { %v4828_v35 = vpop.f32.mrf.mxu1  ;;  %v4852_v36 = vpop.f32.mrf.mxu0  ;;  %v5479_v33 = vmov -1e+09  }
 0x2cb   :  { %v1016_v37 = vsel %vm919_vm5, %v905_v34, 0  ;;  %v1397_v11 = vsel %vm1395_vm6, %v911_v5, 0  ;;  %v167_v31 = vrot.slane %v153_v28, %v151_v26  ;;  %v171_v32 = vrot.slane %v160_v29, %v170_v30 }
 0x2cc   :  { %v573_v38 = vpop.f32.mrf.mxu1  ;;  %v5769_v39 = vpop.f32.mrf.mxu0  ;;  %4891 = vmatpush3.bf16.xpose.msra.mxu0 %v1016_v37  ;;  %v141_v34 = vsel %vm140_vm7, 0.0, %v5479_v33 }
 0x2cd   :  { %v906_v40 = vpack.c.bf16 %v573_v38, %v573_v38  ;;  %4902 = vmatprep.subr.bf16.mxu0 %v5476_v2  ;;  %v912_v12 = vpack.c.bf16 %v5769_v39, %v5769_v39  ;;  %v175_v35 = vrot.slane %v167_v31, %v170_v30  ;;  %v5831_v36 = vadd.f32 %v171_v32, %v141_v34 }
 0x2ce   :  { %v4829_v41 = vpop.f32.mrf.mxu1  ;;  %v4853_v42 = vpop.f32.mrf.mxu0 }
 0x2cf   :  { %v1062_v44 = vsel %vm919_vm5, %v906_v40, 0  ;;  %v1443_v17 = vsel %vm1395_vm6, %v912_v12, 0  ;;  %v5833_v38 = vadd.f32 %v175_v35, %v141_v34 }
 0x2d0   :  { %v676_v45 = vpop.f32.mrf.mxu1  ;;  %v5773_v46 = vpop.f32.mrf.mxu0  ;;  %4897 = vmatpush3.bf16.xpose.msra.mxu1 %v1062_v44 }
 0x2d1   :  { %4908 = vmatprep.subr.bf16.mxu1 %v5476_v2  ;;  %v909_v58 = vpack.c.bf16 %v676_v45, %v676_v45 }
 0x2d2   :  { %v4844_v48 = vpop.f32.mrf.mxu1  ;;  %v4868_v49 = vpop.f32.mrf.mxu0 }
 0x2d3   :  { %4893 = vmatmul.mubr.msk.bf16.vlgmr.msra.gmra.mxu0 %vm919_vm5, %v897_v47  ;;  %v1200_v63 = vsel %vm919_vm5, %v909_v58, 0 }
 0x2d4   :  { %v679_v52 = vpop.f32.mrf.mxu1  ;;  %v5778_v53 = vpop.f32.mrf.mxu0  ;;  %4903 = vmatpush3.bf16.xpose.msra.mxu0 %v1108_v50  ;;  %4904 = vmatprep.mubr.msk.bf16.mxu0 %vm5477_vm0, %v5476_v2 }
 0x2d5   :  { %4914 = vmatprep.subr.bf16.mxu0 %v5476_v2  ;;  %v910_v0 = vpack.c.bf16 %v679_v52, %v679_v52 }
 0x2d6   :  { %v4845_v55 = vpop.f32.mrf.mxu1  ;;  %v4869_v56 = vpop.f32.mrf.mxu0 }
 0x2d7   :  { %4899 = vmatmul.mubr.msk.bf16.vlgmr.msra.gmra.mxu1 %vm919_vm5, %v898_v54  ;;  %v1246_v6 = vsel %vm919_vm5, %v910_v0, 0 }
 0x2d8   :  { %v5785_v59 = vpop.f32.mrf.mxu1  ;;  %4909 = vmatpush3.bf16.xpose.msra.mxu1 %v1154_v57  ;;  %4910 = vmatprep.mubr.msk.bf16.mxu1 %vm5477_vm0, %v5476_v2 }
 0x2d9   :  { %4920 = vmatprep.subr.bf16.mxu1 %v5476_v2 }
 0x2da   :  { %v4860_v61 = vpop.f32.mrf.mxu1 }
 0x2db   :  { %4905 = vmatmul.mubr.msk.bf16.vlgmr.msra.gmra.mxu0 %vm919_vm5, %v899_v60 }
 0x2dc   :  { %v5794_v1 = vpop.f32.mrf.mxu1  ;;  %4915 = vmatpush3.bf16.xpose.msra.mxu0 %v1200_v63  ;;  %4916 = vmatprep.mubr.msk.bf16.mxu0 %vm5477_vm0, %v5476_v2 }
 0x2dd   :  { %4926 = vmatprep.subr.bf16.mxu0 %v5476_v2 }
 0x2de   :  { %v4861_v62 = vpop.f32.mrf.mxu1 }
 0x2df   :  { %4911 = vmatmul.mubr.msk.bf16.vlgmr.msra.gmra.mxu1 %vm919_vm5, %v900_v4 }
 0x2e0   :  { %v5803_v7 = vpop.f32.mrf.mxu1  ;;  %4921 = vmatpush3.bf16.xpose.msra.mxu1 %v1246_v6  ;;  %4922 = vmatprep.mubr.msk.bf16.mxu1 %vm5477_vm0, %v5476_v2 }
 0x2e1   :  { %4932 = vmatprep.subr.bf16.mxu1 %v5476_v2 }
 0x2e2   :  { %v4876_v3 = vpop.f32.mrf.mxu1 }
 0x2e3   :  { %4917 = vmatmul.mubr.msk.bf16.vlgmr.msra.gmra.mxu0 %vm919_vm5, %v901_v10 }
 0x2e4   :  { %v5814_v13 = vpop.f32.mrf.mxu1  ;;  %4927 = vmatpush3.bf16.msra.mxu0 %v1397_v11  ;;  %4928 = vmatprep.mubr.msk.bf16.mxu0 %vm5477_vm0, %v5476_v2 }
 0x2e5   :  { %4938 = vmatprep.subr.bf16.mxu0 %v5476_v2 }
 0x2e6   :  { %v4877_v16 = vpop.f32.mrf.mxu1 }
 0x2e7   :  { %4923 = vmatmul.mubr.msk.bf16.vlgmr.msra.gmra.mxu1 %vm919_vm5, %v902_v14 }
 0x2e8   :  { %4933 = vmatpush3.bf16.msra.mxu1 %v1443_v17  ;;  %4934 = vmatprep.mubr.msk.bf16.mxu1 %vm5477_vm0, %v5476_v2 }
 0x2e9   :  { %4944 = vmatprep.subr.bf16.mxu1 %v5476_v2 }
 0x383   :  { %v960_v37 = vpop.f32.mrf.mxu0 }
 0x384   :  { %v1288_v8 = vadd.f32 %v960_v37, %v5831_v36 }
 0x385   :  { %v4882_v39 = vpop.f32.mrf.mxu0 }
 0x386   :  { %v1296_v40 = vsel %vm919_vm5, %v1288_v8, -inf }
 0x387   :  { %v1006_v41 = vpop.f32.mrf.mxu1  ;;  %1297 = vmax.xlane.f32.xlu0 %v1296_v40  ;;  %v963_v42 = vpop.f32.mrf.mxu0 }
 0x388   :  { %v1289_v9 = vadd.f32 %v1006_v41, %v5833_v38 }
 0x389   :  { %v4883_v43 = vpop.f32.mrf.mxu0  ;;  %v4888_v44 = vpop.f32.mrf.mxu1 }
 0x38a   :  { %v1299_v45 = vsel %vm919_vm5, %v1289_v9, -inf }
 0x38b   :  { %1300 = vmax.xlane.f32.xlu1 %v1299_v45  ;;  %v1009_v47 = vpop.f32.mrf.mxu1 }
 0x38d   :  { %v4889_v48 = vpop.f32.mrf.mxu1 }
 0x393   :  { %v1052_v49 = vpop.f32.mrf.mxu0 }
 0x394   :  { %v1290_v50 = vadd.f32 %v1052_v49, %v5831_v36 }
 0x395   :  { %v4894_v51 = vpop.f32.mrf.mxu0 }
 0x396   :  { %v1302_v52 = vsel %vm919_vm5, %v1290_v50, -inf }
 0x397   :  { %v1098_v54 = vpop.f32.mrf.mxu1  ;;  %1303 = vmax.xlane.f32.xlu1 %v1302_v52  ;;  %v1055_v55 = vpop.f32.mrf.mxu0 }
 0x398   :  { %v1291_v56 = vadd.f32 %v1098_v54, %v5833_v38 }
 0x399   :  { %v4895_v57 = vpop.f32.mrf.mxu0  ;;  %v4900_v58 = vpop.f32.mrf.mxu1 }
 0x39a   :  { %v1305_v60 = vsel %vm919_vm5, %v1291_v56, -inf }
 0x39b   :  { %v1101_v61 = vpop.f32.mrf.mxu1  ;;  %1306 = vmax.xlane.f32.xlu1 %v1305_v60  ;;  %v1144_v63 = vpop.f32.mrf.mxu0 }
 0x39c   :  { %v1292_v0 = vadd.f32 %v1144_v63, %v5831_v36 }
 0x39d   :  { %v4901_v4 = vpop.f32.mrf.mxu1  ;;  %v4906_v62 = vpop.f32.mrf.mxu0 }
 0x39e   :  { %v1308_v5 = vsel %vm919_vm5, %v1292_v0, -inf }
 0x39f   :  { %v1190_v6 = vpop.f32.mrf.mxu1  ;;  %1309 = vmax.xlane.f32.xlu1 %v1308_v5  ;;  %v1147_v10 = vpop.f32.mrf.mxu0 }
 0x3a0   :  { %v1293_v3 = vadd.f32 %v1190_v6, %v5833_v38 }
 0x3a1   :  { %v4907_v11 = vpop.f32.mrf.mxu0  ;;  %v4912_v12 = vpop.f32.mrf.mxu1 }
 0x3a2   :  { %v1311_v14 = vsel %vm919_vm5, %v1293_v3, -inf }
 0x3a3   :  { %v1193_v16 = vpop.f32.mrf.mxu1  ;;  %1312 = vmax.xlane.f32.xlu1 %v1311_v14  ;;  %v1236_v17 = vpop.f32.mrf.mxu0 }
 0x3a4   :  { %v1294_v18 = vadd.f32 %v1236_v17, %v5831_v36 }
 0x3a5   :  { %v4913_v20 = vpop.f32.mrf.mxu1  ;;  %v4918_v21 = vpop.f32.mrf.mxu0 }
 0x3a6   :  { %v1314_v22 = vsel %vm919_vm5, %v1294_v18, -inf  ;;  %v913_v21 = vpack.c.bf16 %v5785_v59, %v5785_v59 }
 0x3a7   :  { %v1282_v23 = vpop.f32.mrf.mxu1  ;;  %1315 = vmax.xlane.f32.xlu1 %v1314_v22  ;;  %v1239_v24 = vpop.f32.mrf.mxu0 }
 0x3a8   :  { %v1295_v25 = vadd.f32 %v1282_v23, %v5833_v38 }
 0x3a9   :  { %v4919_v26 = vpop.f32.mrf.mxu0  ;;  %v4924_v27 = vpop.f32.mrf.mxu1 }
 0x3aa   :  { %v1317_v28 = vsel %vm919_vm5, %v1295_v25, -inf  ;;  %v1489_v26 = vsel %vm1395_vm6, %v913_v21, 0  ;;  %v914_v27 = vpack.c.bf16 %v5794_v1, %v5794_v1 }
 0x3ab   :  { %v1285_v29 = vpop.f32.mrf.mxu1  ;;  %1318 = vmax.xlane.f32.xlu1 %v1317_v28 }
 0x3ad   :  { %v4925_v30 = vpop.f32.mrf.mxu1 }
 0x3ae   :  { %v1535_v30 = vsel %vm1395_vm6, %v914_v27, 0 }
 0x410   :  { %v1298_v31 = vpop.xlane.xlu0 %1297 }
 0x411   :  { %v1320_v32 = vsub.f32 %v1288_v8, %v1298_v31 }
 0x413   :  { %v1328_v33 = vmul.f32 1.442695, %v1320_v32 }
 0x414   :  { %v1301_v34 = vpop.xlane.xlu1 %1300 }
 0x415   :  { %5359 = vpow2.f32 %v1328_v33  ;;  %v1321_v35 = vsub.f32 %v1289_v9, %v1301_v34  ;;  %v915_v33 = vpack.c.bf16 %v5773_v46, %v5773_v46 }
 0x417   :  { %v1330_v37 = vmul.f32 1.442695, %v1321_v35 }
 0x419   :  { %5361 = vpow2.f32 %v1330_v37 }
 0x420   :  { %v1304_v39 = vpop.xlane.xlu1 %1303 }
 0x421   :  { %v1322_v40 = vsub.f32 %v1290_v50, %v1304_v39 }
 0x422   :  { %v5360_v41 = vpop.eup %5359 }
 0x423   :  { %v1332_v42 = vmul.f32 1.442695, %v1322_v40  ;;  %v1344_v43 = vsel %vm919_vm5, %v5360_v41, 0.0  ;;  %v1581_v40 = vsel %vm1395_vm6, %v915_v33, 0 }
 0x424   :  { %v1307_v44 = vpop.xlane.xlu1 %1306  ;;  %1345 = vadd.xlane.f32.xlu1 %v1344_v43 }
 0x425   :  { %5363 = vpow2.f32 %v1332_v42  ;;  %v1323_v45 = vsub.f32 %v1291_v56, %v1307_v44 }
 0x426   :  { %v5362_v47 = vpop.eup %5361 }
 0x427   :  { %v1334_v48 = vmul.f32 1.442695, %v1323_v45  ;;  %v1347_v8 = vsel %vm919_vm5, %v5362_v47, 0.0 }
 0x428   :  { %1348 = vadd.xlane.f32.xlu0 %v1347_v8  ;;  %v1310_v49 = vpop.xlane.xlu1 %1309 }
 0x429   :  { %5365 = vpow2.f32 %v1334_v48  ;;  %v1324_v9 = vsub.f32 %v1292_v0, %v1310_v49 }
 0x42b   :  { %v1336_v51 = vmul.f32 1.442695, %v1324_v9  ;;  %v918_v9 = vpack.c.bf16 %v5814_v13, %v5814_v13 }
 0x42c   :  { %v1313_v52 = vpop.xlane.xlu1 %1312 }
 0x42d   :  { %5367 = vpow2.f32 %v1336_v51  ;;  %v1325_v50 = vsub.f32 %v1293_v3, %v1313_v52 }
 0x42f   :  { %v1338_v54 = vmul.f32 1.442695, %v1325_v50  ;;  %v1719_v50 = vsel %vm1395_vm6, %v918_v9, 0 }
 0x430   :  { %v1316_v55 = vpop.xlane.xlu1 %1315 }
 0x431   :  { %5369 = vpow2.f32 %v1338_v54  ;;  %v1326_v57 = vsub.f32 %v1294_v18, %v1316_v55 }
 0x432   :  { %v5364_v58 = vpop.eup %5363 }
 0x433   :  { %v1340_v60 = vmul.f32 1.442695, %v1326_v57  ;;  %v1350_v56 = vsel %vm919_vm5, %v5364_v58, 0.0 }
 0x434   :  { %1351 = vadd.xlane.f32.xlu1 %v1350_v56  ;;  %v1319_v61 = vpop.xlane.xlu1 %1318 }
 0x435   :  { %5371 = vpow2.f32 %v1340_v60  ;;  %v1327_v63 = vsub.f32 %v1295_v25, %v1319_v61  ;;  %v1765_v60 = vld [vmem:[%s6465_s5] sm:$0xf]  ;;  %v1766_v61 = vld [vmem:[%s6465_s5 + $0x4] sm:$0xf] }
 0x436   :  { %v5366_v4 = vpop.eup %5365  ;;  %v1773_v56 = vsel %vm1395_vm6, %v1765_v60, 0 }
 0x437   :  { %v1342_v62 = vmul.f32 1.442695, %v1327_v63  ;;  %v1353_v0 = vsel %vm919_vm5, %v5366_v4, 0.0  ;;  %v1820_v63 = vsel %vm1395_vm6, %v1766_v61, 0 }
 0x438   :  { %1354 = vadd.xlane.f32.xlu0 %v1353_v0  ;;  %v1767_v0 = vld [vmem:[%s6465_s5 + $0x8] sm:$0xf] }
 0x439   :  { %5373 = vpow2.f32 %v1342_v62 }
 0x43a   :  { %v5855_v5 = vpop.eup %5367 }
 0x43b   :  { %v1356_v6 = vsel %vm919_vm5, %v5855_v5, 0.0 }
 0x43c   :  { %1357 = vadd.xlane.f32.xlu1 %v1356_v6 }
 0x43e   :  { %v5859_v10 = vpop.eup %5369 }
 0x43f   :  { %v1359_v3 = vsel %vm919_vm5, %v5859_v10, 0.0 }
 0x440   :  { %1360 = vadd.xlane.f32.xlu0 %v1359_v3  ;;  %v1867_v3 = vsel %vm1395_vm6, %v1767_v0, 0 }
 0x442   :  { %v5863_v11 = vpop.eup %5371 }
 0x443   :  { %v1362_v12 = vsel %vm919_vm5, %v5863_v11, 0.0 }
 0x444   :  { %1363 = vadd.xlane.f32.xlu1 %v1362_v12 }
 0x446   :  { %v5867_v14 = vpop.eup %5373 }
 0x447   :  { %v1365_v16 = vsel %vm919_vm5, %v5867_v14, 0.0 }
 0x448   :  { %1366 = vadd.xlane.f32.xlu0 %v1365_v16 }
 0x4ad   :  { %v1346_v17 = vpop.xlane.xlu1 %1345 }
 0x4ae   :  { %5375 = vrcp.f32 %v1346_v17 }
 0x4b1   :  { %v1349_v18 = vpop.xlane.xlu0 %1348 }
 0x4b2   :  { %5377 = vrcp.f32 %v1349_v18 }
 0x4bb   :  { %v5376_v20 = vpop.eup %5375 }
 0x4bc   :  { %v1376_v22 = vmul.f32 %v5376_v20, %v5360_v41  ;;  %v916_v41 = vpack.c.bf16 %v5778_v53, %v5778_v53  ;;  %v1768_v20 = vld [vmem:[%s6465_s5 + $0xc] sm:$0xf] }
 0x4bd   :  { %v1352_v23 = vpop.xlane.xlu1 %1351 }
 0x4be   :  { %5379 = vrcp.f32 %v1352_v23  ;;  %v1384_v24 = vpack.c.bf16 %v1376_v22, %v1376_v22  ;;  %v1627_v45 = vsel %vm1395_vm6, %v916_v41, 0 }
 0x4bf   :  { %v5378_v25 = vpop.eup %5377 }
 0x4c0   :  { %4929 = vmatmul.mubr.msk.bf16.vlgmr.msra.gmra.mxu0 %vm919_vm5, %v1384_v24  ;;  %v1377_v28 = vmul.f32 %v5378_v25, %v5362_v47  ;;  %v917_v47 = vpack.c.bf16 %v5803_v7, %v5803_v7  ;;  %v1914_v24 = vsel %vm1395_vm6, %v1768_v20, 0 }
 0x4c1   :  { %4939 = vmatpush3.bf16.msra.mxu0 %v1489_v26  ;;  %v1355_v29 = vpop.xlane.xlu0 %1354  ;;  %4940 = vmatprep.mubr.msk.bf16.mxu0 %vm5477_vm0, %v5476_v2 }
 0x4c2   :  { %5381 = vrcp.f32 %v1355_v29  ;;  %v1385_v59 = vpack.c.bf16 %v1377_v28, %v1377_v28  ;;  %4950 = vmatprep.subr.bf16.mxu0 %v5476_v2  ;;  %v1673_v49 = vsel %vm1395_vm6, %v917_v47, 0 }
 0x4c4   :  { %4935 = vmatmul.mubr.msk.bf16.vlgmr.msra.gmra.mxu1 %vm919_vm5, %v1385_v59 }
 0x4c5   :  { %4945 = vmatpush3.bf16.msra.mxu1 %v1535_v30  ;;  %v1358_v31 = vpop.xlane.xlu1 %1357  ;;  %4946 = vmatprep.mubr.msk.bf16.mxu1 %vm5477_vm0, %v5476_v2 }
 0x4c6   :  { %5383 = vrcp.f32 %v1358_v31  ;;  %4956 = vmatprep.subr.bf16.mxu1 %v5476_v2 }
 0x4c9   :  { %v1361_v1 = vpop.xlane.xlu0 %1360 }
 0x4ca   :  { %5385 = vrcp.f32 %v1361_v1 }
 0x4cb   :  { %v5380_v32 = vpop.eup %5379 }
 0x4cc   :  { %v1378_v34 = vmul.f32 %v5380_v32, %v5364_v58 }
 0x4cd   :  { %v1364_v35 = vpop.xlane.xlu1 %1363 }
 0x4ce   :  { %5387 = vrcp.f32 %v1364_v35  ;;  %v1386_v37 = vpack.c.bf16 %v1378_v34, %v1378_v34 }
 0x4cf   :  { %v5382_v39 = vpop.eup %5381 }
 0x4d0   :  { %4941 = vmatmul.mubr.msk.bf16.vlgmr.msra.gmra.mxu0 %vm919_vm5, %v1386_v37  ;;  %v1379_v42 = vmul.f32 %v5382_v39, %v5366_v4 }
 0x4d1   :  { %4951 = vmatpush3.bf16.msra.mxu0 %v1581_v40  ;;  %v1367_v43 = vpop.xlane.xlu0 %1366  ;;  %4952 = vmatprep.mubr.msk.bf16.mxu0 %vm5477_vm0, %v5476_v2 }
 0x4d2   :  { %5389 = vrcp.f32 %v1367_v43  ;;  %v1387_v46 = vpack.c.bf16 %v1379_v42, %v1379_v42  ;;  %4962 = vmatprep.subr.bf16.mxu0 %v5476_v2 }
 0x4d3   :  { %v5384_v44 = vpop.eup %5383 }
 0x4d4   :  { %4947 = vmatmul.mubr.msk.bf16.vlgmr.msra.gmra.mxu1 %vm919_vm5, %v1387_v46  ;;  %v1380_v53 = vmul.f32 %v5384_v44, %v5855_v5 }
 0x4d5   :  { %4957 = vmatpush3.bf16.msra.mxu1 %v1627_v45  ;;  %4958 = vmatprep.mubr.msk.bf16.mxu1 %vm5477_vm0, %v5476_v2 }
 0x4d6   :  { %v1388_v48 = vpack.c.bf16 %v1380_v53, %v1380_v53  ;;  %4968 = vmatprep.subr.bf16.mxu1 %v5476_v2 }
 0x4d7   :  { %v5386_v8 = vpop.eup %5385 }
 0x4d8   :  { %4953 = vmatmul.mubr.msk.bf16.vlgmr.msra.gmra.mxu0 %vm919_vm5, %v1388_v48  ;;  %v1381_v7 = vmul.f32 %v5386_v8, %v5859_v10 }
 0x4d9   :  { %4963 = vmatpush3.bf16.msra.mxu0 %v1673_v49  ;;  %4964 = vmatprep.mubr.msk.bf16.mxu0 %vm5477_vm0, %v5476_v2 }
 0x4da   :  { %v1389_v51 = vpack.c.bf16 %v1381_v7, %v1381_v7  ;;  %4974 = vmatprep.subr.bf16.mxu0 %v5476_v2 }
 0x4db   :  { %v5388_v52 = vpop.eup %5387 }
 0x4dc   :  { %4959 = vmatmul.mubr.msk.bf16.vlgmr.msra.gmra.mxu1 %vm919_vm5, %v1389_v51  ;;  %v1382_v54 = vmul.f32 %v5388_v52, %v5863_v11 }
 0x4dd   :  { %4969 = vmatpush3.bf16.msra.mxu1 %v1719_v50  ;;  %4970 = vmatprep.mubr.msk.bf16.mxu1 %vm5477_vm0, %v5476_v2 }
 0x4de   :  { %v1390_v13 = vpack.c.bf16 %v1382_v54, %v1382_v54  ;;  %4980 = vmatprep.subr.bf16.mxu1 %v5476_v2 }
 0x4df   :  { %v5390_v55 = vpop.eup %5389 }
 0x4e0   :  { %4965 = vmatmul.mubr.msk.bf16.vlgmr.msra.gmra.mxu0 %vm919_vm5, %v1390_v13  ;;  %v1383_v57 = vmul.f32 %v5390_v55, %v5867_v14 }
 0x4e1   :  { %4976 = vmatprep.mubr.msk.bf16.mxu0 %vm5477_vm0, %v5476_v2  ;;  %4975 = vmatpush3.bf16.msra.mxu0 %v1773_v56 }
 0x4e2   :  { %v1391_v58 = vpack.c.bf16 %v1383_v57, %v1383_v57  ;;  %4986 = vmatprep.subr.bf16.mxu0 %v5476_v2 }
 0x4e4   :  { %4971 = vmatmul.mubr.msk.bf16.vlgmr.msra.gmra.mxu1 %vm919_vm5, %v1391_v58 }
 0x4e5   :  { %4982 = vmatprep.mubr.msk.bf16.mxu1 %vm5477_vm0, %v5476_v2  ;;  %4981 = vmatpush3.bf16.msra.mxu1 %v1820_v63 }
 0x4e6   :  { %4992 = vmatprep.subr.bf16.mxu1 %v5476_v2 }
 0x580   :  { %v1433_v4 = vpop.f32.mrf.mxu0 }
 0x582   :  { %v4930_v62 = vpop.f32.mrf.mxu0 }
 0x584   :  { %v1436_v5 = vpop.f32.mrf.mxu0  ;;  %v1479_v6 = vpop.f32.mrf.mxu1 }
 0x585   :  { %v1761_v10 = vpack.c.bf16 %v1479_v6, %v1433_v4 }
 0x586   :  { %v4931_v11 = vpop.f32.mrf.mxu0  ;;  %v4936_v12 = vpop.f32.mrf.mxu1 }
 0x587   :  { %4977 = vmatmul.mubr.msk.bf16.vlgmr.msra.gmra.mxu0 %vm919_vm5, %v1761_v10 }
 0x588   :  { %v1482_v14 = vpop.f32.mrf.mxu1  ;;  %4987 = vmatpush3.bf16.msra.mxu0 %v1867_v3  ;;  %4988 = vmatprep.mubr.msk.bf16.mxu0 %vm5477_vm0, %v5476_v2 }
 0x589   :  { %4998 = vmatprep.subr.bf16.mxu0 %v5476_v2 }
 0x58a   :  { %v4937_v16 = vpop.f32.mrf.mxu1 }
 0x590   :  { %v1525_v17 = vpop.f32.mrf.mxu0 }
 0x592   :  { %v4942_v18 = vpop.f32.mrf.mxu0 }
 0x594   :  { %v1528_v21 = vpop.f32.mrf.mxu0  ;;  %v1571_v22 = vpop.f32.mrf.mxu1 }
 0x595   :  { %v1762_v23 = vpack.c.bf16 %v1571_v22, %v1525_v17 }
 0x596   :  { %v4943_v25 = vpop.f32.mrf.mxu0  ;;  %v4948_v26 = vpop.f32.mrf.mxu1 }
 0x597   :  { %4983 = vmatmul.mubr.msk.bf16.vlgmr.msra.gmra.mxu1 %vm919_vm5, %v1762_v23  ;;  %v5313_v23 = vld [vmem:[%s6467_s7 + $0x8] sm:$0xff]   ;;  %v5316_v25 = vld [vmem:[%s6468_s8] sm:$0xff]  }
 0x598   :  { %v1574_v27 = vpop.f32.mrf.mxu1  ;;  %v1617_v28 = vpop.f32.mrf.mxu0  ;;  %4993 = vmatpush3.bf16.msra.mxu1 %v1914_v24  ;;  %4994 = vmatprep.mubr.msk.bf16.mxu1 %vm5477_vm0, %v5476_v2  ;;  %v5314_v24 = vld [vmem:[%s6468_s8 + $0x8] sm:$0xff]  }
 0x599   :  { %5006 = vmatprep.subr.bf16.mxu1 %v5476_v2 }
 0x59a   :  { %v4949_v29 = vpop.f32.mrf.mxu1  ;;  %v4954_v59 = vpop.f32.mrf.mxu0 }
 0x59c   :  { %v1620_v30 = vpop.f32.mrf.mxu0  ;;  %v1663_v31 = vpop.f32.mrf.mxu1 }
 0x59d   :  { %v1763_v1 = vpack.c.bf16 %v1663_v31, %v1617_v28 }
 0x59e   :  { %v4955_v32 = vpop.f32.mrf.mxu0  ;;  %v4960_v33 = vpop.f32.mrf.mxu1 }
 0x59f   :  { %4989 = vmatmul.mubr.msk.bf16.vlgmr.msra.gmra.mxu0 %vm919_vm5, %v1763_v1  ;;  %v4428_v33 = vld [vmem:[%s6466_s6] ss:$0 sm:$0xff] }
 0x5a0   :  { %v1666_v34 = vpop.f32.mrf.mxu1  ;;  %v1709_v35 = vpop.f32.mrf.mxu0  ;;  %5002 = vmatprep.mubr.msk.bf16.mxu0 %vm5477_vm0, %v5476_v2  ;;  %4999 = vmatpush3.bf16.msra.mxu0 %v5313_v23 }
 0x5a1   :  { %5000 = vmatprep.subr.bf16.mxu0 %v5476_v2 }
 0x5a2   :  { %v4961_v37 = vpop.f32.mrf.mxu1  ;;  %v4966_v39 = vpop.f32.mrf.mxu0 }
 0x5a4   :  { %v1712_v40 = vpop.f32.mrf.mxu0  ;;  %v1755_v41 = vpop.f32.mrf.mxu1 }
 0x5a5   :  { %v1764_v42 = vpack.c.bf16 %v1755_v41, %v1709_v35  ;;  %v5317_v40 = vld [vmem:[%s6469_s9 + $0x18] sm:$0xff]   ;;  %v5318_v41 = vld [vmem:[%s6469_s9 + $0x10] sm:$0xff]  }
 0x5a6   :  { %v4967_v43 = vpop.f32.mrf.mxu0  ;;  %v4972_v46 = vpop.f32.mrf.mxu1 }
 0x5a7   :  { %4995 = vmatmul.mubr.msk.bf16.vlgmr.msra.gmra.mxu1 %vm919_vm5, %v1764_v42  ;;  %v5319_v42 = vld [vmem:[%s6469_s9 + $0x8] sm:$0xff]   ;;  %v5320_v43 = vld [vmem:[%s6469_s9] sm:$0xff]  }
 0x5a8   :  { %v1758_v44 = vpop.f32.mrf.mxu1  ;;  %5010 = vmatprep.mubr.msk.bf16.mxu1 %vm5477_vm0, %v5476_v2  ;;  %5007 = vmatpush3.bf16.msra.mxu1 %v5314_v24 }
 0x5a9   :  { %5008 = vmatprep.subr.bf16.mxu1 %v5476_v2 }
 0x5aa   :  { %v4973_v45 = vpop.f32.mrf.mxu1 }
 0x5ac   :  { %5009 = vmatpush3.bf16.msra.mxu1 %v5316_v25 }
 0x5ad   :  { %5026 = vmatprep.subr.bf16.mxu1 %v5476_v2 }
 0x647   :  { %v1809_v47 = vpop.f32.mrf.mxu0 }
 0x648   :  { %v1957_v55 = vsel %vm183_vm4, %v1809_v47, 0.0 }
 0x649   :  { %v4978_v53 = vpop.f32.mrf.mxu0 }
 0x64b   :  { %v1812_v48 = vpop.f32.mrf.mxu0 }
 0x64c   :  { %v1964_v4 = vsel %vm183_vm4, %v1812_v48, 0.0 }
 0x64d   :  { %v4979_v8 = vpop.f32.mrf.mxu0 }
 0x657   :  { %v1856_v49 = vpop.f32.mrf.mxu1 }
 0x658   :  { %v1958_v54 = vsel %vm183_vm4, %v1856_v49, 0.0 }
 0x659   :  { %v4984_v9 = vpop.f32.mrf.mxu1  ;;  %v1959_v58 = vadd.f32 %v1958_v54, %v1957_v55 }
 0x65b   :  { %v1859_v7 = vpop.f32.mrf.mxu1 }
 0x65c   :  { %v1965_v56 = vsel %vm183_vm4, %v1859_v7, 0.0 }
 0x65d   :  { %v4985_v51 = vpop.f32.mrf.mxu1  ;;  %v1966_v5 = vadd.f32 %v1965_v56, %v1964_v4 }
 0x65f   :  { %v1903_v52 = vpop.f32.mrf.mxu0 }
 0x660   :  { %v1960_v57 = vsel %vm183_vm4, %v1903_v52, 0.0 }
 0x661   :  { %v4990_v50 = vpop.f32.mrf.mxu0  ;;  %v1961_v61 = vadd.f32 %v1960_v57, %v1959_v58 }
 0x663   :  { %v1906_v13 = vpop.f32.mrf.mxu0 }
 0x664   :  { %v1967_v62 = vsel %vm183_vm4, %v1906_v13, 0.0 }
 0x665   :  { %v4991_v60 = vpop.f32.mrf.mxu0  ;;  %v1968_v3 = vadd.f32 %v1967_v62, %v1966_v5 }
 0x667   :  { %v1950_v63 = vpop.f32.mrf.mxu1 }
 0x668   :  { %v1962_v0 = vsel %vm183_vm4, %v1950_v63, 0.0 }
 0x669   :  { %v1963_v6 = vadd.f32 %v1962_v0, %v1961_v61  ;;  %v4996_v10 = vpop.f32.mrf.mxu1 }
 0x66b   :  { %v5963_v11 = vadd.f32 %v1963_v6, %v5589_v15  ;;  %v1953_v12 = vpop.f32.mrf.mxu1 }
 0x66c   :  { %v1969_v14 = vsel %vm183_vm4, %v1953_v12, 0.0 }
 0x66d   :  { %v1970_v16 = vadd.f32 %v1969_v14, %v1968_v3  ;;  %v4997_v17 = vpop.f32.mrf.mxu1  ;;  %v1974_v18 = vmul.f32 %v5963_v11, %v5963_v11 }
 0x66e   :  { %v5323_v17 = vld [vmem:[%s6464_s4 + $0xc0] sm:$0xff]  }
 0x66f   :  { %v5969_v20 = vadd.f32 %v1970_v16, %v5594_v19  ;;  %v1976_v21 = vsel %vm183_vm4, %v1974_v18, 0.0  ;;  %v5315_v19 = vld [vmem:[%s6467_s7] sm:$0xff]   ;;  %v5322_v16 = vld [vmem:[%s6464_s4 + $0xe8] sm:$0xff]  }
 0x670   :  { %1977 = vadd.xlane.f32.xlu1 %v1976_v21  ;;  %5001 = vmatpush3.bf16.msra.mxu0 %v5315_v19  ;;  %v5324_v18 = vld [vmem:[%s6464_s4 + $0xe0] sm:$0xff]  }
 0x671   :  { %v1975_v22 = vmul.f32 %v5969_v20, %v5969_v20  ;;  %5014 = vmatprep.subr.bf16.mxu0 %v5476_v2 }
 0x673   :  { %v1979_v15 = vsel %vm183_vm4, %v1975_v22, 0.0 }
 0x674   :  { %1980 = vadd.xlane.f32.xlu0 %v1979_v15 }
 0x6f9   :  { %v1978_v26 = vpop.xlane.xlu1 %1977 }
 0x6fa   :  { %v1982_v27 = vmul.f32 0.03125, %v1978_v26 }
 0x6fc   :  { %v1984_v28 = vadd.f32 1e-06, %v1982_v27  ;;  %v4443_v27 = vld [vmem:[%s6463_s3 + $0x1] ss:$0 sm:$0xff] }
 0x6fd   :  { %v1981_v29 = vpop.xlane.xlu0 %1980 }
 0x6fe   :  { %5391 = vrsqrt.f32 %v1984_v28  ;;  %v1983_v59 = vmul.f32 0.03125, %v1981_v29 }
 0x700   :  { %v1985_v30 = vadd.f32 1e-06, %v1983_v59 }
 0x702   :  { %5393 = vrsqrt.f32 %v1985_v30  ;;  %v5325_v30 = vld [vmem:[%s6464_s4 + $0xd8] sm:$0xff]  }
 0x70b   :  { %v5392_v31 = vpop.eup %5391 }
 0x70c   :  { %v1988_v1 = vmul.f32 %v5392_v31, %v5963_v11  ;;  %v5326_v31 = vld [vmem:[%s6464_s4 + $0x108] sm:$0xff]  }
 0x70e   :  { %v1996_v35 = vmul.f32 %v4428_v33, %v1988_v1 }
 0x70f   :  { %v5394_v32 = vpop.eup %5393 }
 0x710   :  { %v1989_v34 = vmul.f32 %v5394_v32, %v5969_v20  ;;  %v5327_v32 = vld [vmem:[%s6464_s4 + $0xd0] sm:$0xff]  }
 0x712   :  { %v1997_v37 = vmul.f32 %v4428_v33, %v1989_v34  ;;  %v5328_v33 = vld [vmem:[%s6464_s4 + $0x100] sm:$0xff]   ;;  %v5329_v34 = vld [vmem:[%s6464_s4 + $0xf8] sm:$0xff]  }
 0x714   :  { %v1998_v39 = vpack.c.bf16 %v1997_v37, %v1996_v35  ;;  %v5330_v35 = vld [vmem:[%s6464_s4 + $0x128] sm:$0xff]   ;;  %v5331_v37 = vld [vmem:[%s6464_s4 + $0xf0] sm:$0xff]  }
 0x716   :  { %5003 = vmatmul.mubr.msk.bf16.vlgmr.msra.gmra.mxu0 %vm183_vm4, %v1998_v39  ;;  %5011 = vmatmul.mubr.msk.bf16.vlgmr.msra.gmra.mxu1 %vm183_vm4, %v1998_v39  ;;  %v5332_v39 = vld [vmem:[%s6464_s4 + $0x120] sm:$0xff]  }
 0x717   :  { %5022 = vmatprep.mubr.msk.bf16.mxu0 %vm5477_vm0, %v5476_v2  ;;  %5030 = vmatprep.mubr.msk.bf16.mxu1 %vm5477_vm0, %v5476_v2 }
 0x718   :  { %5015 = vmatpush3.bf16.msra.mxu0 %v5317_v40  ;;  %v5333_v40 = vld [vmem:[%s6464_s4 + $0x118] sm:$0xff]  }
 0x719   :  { %5016 = vmatprep.subr.bf16.mxu0 %v5476_v2 }
 0x71c   :  { %5017 = vmatpush3.bf16.msra.mxu0 %v5318_v41  ;;  %v5334_v41 = vld [vmem:[%s6464_s4 + $0x148] sm:$0xff]  }
 0x71d   :  { %5018 = vmatprep.subr.bf16.mxu0 %v5476_v2 }
 0x720   :  { %5019 = vmatpush3.bf16.msra.mxu0 %v5319_v42  ;;  %v5335_v42 = vld [vmem:[%s6464_s4 + $0x110] sm:$0xff]  }
 0x721   :  { %5020 = vmatprep.subr.bf16.mxu0 %v5476_v2 }
 0x724   :  { %5021 = vmatpush3.bf16.msra.mxu0 %v5320_v43  ;;  %v5336_v43 = vld [vmem:[%s6464_s4 + $0x140] sm:$0xff]  }
 0x725   :  { %5042 = vmatprep.subr.bf16.mxu0 %v5476_v2 }
 0x7d6   :  { %v2052_v46 = vpop.f32.mrf.mxu0  ;;  %v2109_v44 = vpop.f32.mrf.mxu1 }
 0x7d7   :  { %v4435_v45 = vmul.f32 -1.442695, %v2052_v46 }
 0x7d8   :  { %v5004_v47 = vpop.f32.mrf.mxu0  ;;  %v5012_v53 = vpop.f32.mrf.mxu1 }
 0x7d9   :  { %5395 = vpow2.f32 %v4435_v45  ;;  %v5339_v45 = vld [vmem:[%s6464_s4 + $0x130] sm:$0xff]   ;;  %v5340_v47 = vld [vmem:[%s6464_s4 + $0x160] sm:$0xff]   ;;  %v5341_v53 = vld [vmem:[%s6464_s4 + $0x158] sm:$0xff]  }
 0x7da   :  { %v2055_v48 = vpop.f32.mrf.mxu0  ;;  %v2112_v8 = vpop.f32.mrf.mxu1 }
 0x7db   :  { %v4436_v49 = vmul.f32 -1.442695, %v2055_v48 }
 0x7dc   :  { %v5005_v9 = vpop.f32.mrf.mxu0  ;;  %v5013_v7 = vpop.f32.mrf.mxu1 }
 0x7dd   :  { %5397 = vpow2.f32 %v4436_v49  ;;  %v5344_v49 = vld [vmem:[%s6464_s4 + $0x170] sm:$0xff]  }
 0x7e6   :  { %v5396_v51 = vpop.eup %5395 }
 0x7e7   :  { %v2122_v52 = vadd.f32 1.0, %v5396_v51 }
 0x7e9   :  { %5399 = vrcp.f32 %v2122_v52 }
 0x7ea   :  { %v5398_v50 = vpop.eup %5397 }
 0x7eb   :  { %v2123_v54 = vadd.f32 1.0, %v5398_v50 }
 0x7ed   :  { %5401 = vrcp.f32 %v2123_v54 }
 0x7f6   :  { %v5400_v13 = vpop.eup %5399 }
 0x7f7   :  { %v2128_v55 = vmul.f32 %v5400_v13, %v2052_v46  ;;  %v5337_v46 = vld [vmem:[%s6464_s4 + $0x138] sm:$0xff]  }
 0x7f9   :  { %v2130_v60 = vmul.f32 %v2128_v55, %v2109_v44  ;;  %v5338_v44 = vld [vmem:[%s6464_s4 + $0x168] sm:$0xff]  }
 0x7fa   :  { %v5402_v57 = vpop.eup %5401 }
 0x7fb   :  { %v2129_v58 = vmul.f32 %v5402_v57, %v2055_v48  ;;  %v5342_v48 = vld [vmem:[%s6464_s4 + $0x150] sm:$0xff]  }
 0x7fd   :  { %v2131_v56 = vmul.f32 %v2129_v58, %v2112_v8  ;;  %v5343_v8 = vld [vmem:[%s6464_s4 + $0x178] sm:$0xff]  }
 0x7ff   :  { %v2132_v61 = vpack.c.bf16 %v2131_v56, %v2130_v60 }
 0x801   :  { %5023 = vmatmul.mubr.msk.bf16.vlgmr.msra.gmra.mxu0 %vm93_vm3, %v2132_v61 }
 0x802   :  { %5046 = vmatprep.mubr.msk.bf16.mxu0 %vm5477_vm0, %v5476_v2  ;;  %5043 = vmatpush3.bf16.msra.mxu0 %v5322_v16 }
 0x803   :  { %5044 = vmatprep.subr.bf16.mxu0 %v5476_v2 }
 0x806   :  { %5045 = vmatpush3.bf16.msra.mxu0 %v5324_v18 }
 0x807   :  { %5058 = vmatprep.subr.bf16.mxu0 %v5476_v2 }
 0x8c1   :  { %v2202_v63 = vpop.f32.mrf.mxu0 }
 0x8c2   :  { %v6022_v4 = vadd.f32 %v2202_v63, %v5963_v11  ;;  %v5321_v11 = vld [vmem:[%s6464_s4 + $0xc8] sm:$0xff]  }
 0x8c3   :  { %v5024_v62 = vpop.f32.mrf.mxu0  ;;  %5027 = vmatpush3.bf16.msra.mxu1 %v5321_v11 }
 0x8c4   :  { %v2213_v0 = vmul.f32 %v6022_v4, %v6022_v4  ;;  %5028 = vmatprep.subr.bf16.mxu1 %v5476_v2 }
 0x8c5   :  { %v2205_v5 = vpop.f32.mrf.mxu0 }
 0x8c6   :  { %v6027_v6 = vadd.f32 %v2205_v5, %v5969_v20  ;;  %v2215_v10 = vsel %vm183_vm4, %v2213_v0, 0.0 }
 0x8c7   :  { %2216 = vadd.xlane.f32.xlu1 %v2215_v10  ;;  %v5025_v3 = vpop.f32.mrf.mxu0  ;;  %5029 = vmatpush3.bf16.msra.mxu1 %v5323_v17 }
 0x8c8   :  { %v2214_v12 = vmul.f32 %v6027_v6, %v6027_v6  ;;  %5034 = vmatprep.subr.bf16.mxu1 %v5476_v2 }
 0x8ca   :  { %v2218_v14 = vsel %vm183_vm4, %v2214_v12, 0.0 }
 0x8cb   :  { %2219 = vadd.xlane.f32.xlu0 %v2218_v14 }
 0x950   :  { %v2217_v20 = vpop.xlane.xlu1 %2216 }
 0x951   :  { %v2221_v21 = vmul.f32 0.03125, %v2217_v20 }
 0x953   :  { %v2223_v22 = vadd.f32 1e-06, %v2221_v21 }
 0x954   :  { %v2220_v15 = vpop.xlane.xlu0 %2219 }
 0x955   :  { %5403 = vrsqrt.f32 %v2223_v22  ;;  %v2222_v23 = vmul.f32 0.03125, %v2220_v15 }
 0x957   :  { %v2224_v24 = vadd.f32 1e-06, %v2222_v23 }
 0x959   :  { %5405 = vrsqrt.f32 %v2224_v24 }
 0x962   :  { %v5404_v19 = vpop.eup %5403 }
 0x963   :  { %v2227_v25 = vmul.f32 %v5404_v19, %v6022_v4 }
 0x965   :  { %v2235_v29 = vmul.f32 %v4443_v27, %v2227_v25 }
 0x966   :  { %v5406_v26 = vpop.eup %5405 }
 0x967   :  { %v2228_v28 = vmul.f32 %v5406_v26, %v6027_v6 }
 0x969   :  { %v2236_v59 = vmul.f32 %v4443_v27, %v2228_v28 }
 0x96b   :  { %v6060_v1 = vpack.c.bf16 %v2236_v59, %v2235_v29 }
 0x96d   :  { %5031 = vmatmul.mubr.msk.bf16.vlgmr.msra.gmra.mxu1 %vm183_vm4, %v6060_v1  ;;  %5047 = vmatmul.mubr.msk.bf16.vlgmr.msra.gmra.mxu0 %vm183_vm4, %v6060_v1 }
 0x96e   :  { %5035 = vmatpush3.bf16.msra.mxu1 %v5325_v30  ;;  %5059 = vmatpush3.bf16.msra.mxu0 %v5326_v31 }
 0x96f   :  { %5036 = vmatprep.subr.bf16.mxu1 %v5476_v2  ;;  %5060 = vmatprep.subr.bf16.mxu0 %v5476_v2 }
 0x970   :  { %5038 = vmatprep.mubr.msk.bf16.mxu1 %vm5477_vm0, %v5476_v2  ;;  %5062 = vmatprep.mubr.msk.bf16.mxu0 %vm5477_vm0, %v5476_v2 }
 0x972   :  { %5037 = vmatpush3.bf16.msra.mxu1 %v5327_v32  ;;  %5061 = vmatpush3.bf16.msra.mxu0 %v5328_v33 }
 0x973   :  { %5050 = vmatprep.subr.bf16.mxu1 %v5476_v2  ;;  %5074 = vmatprep.subr.bf16.mxu0 %v5476_v2 }
 0x975   :  { %5039 = vmatmul.mubr.msk.bf16.vlgmr.msra.gmra.mxu1 %vm183_vm4, %v6060_v1  ;;  %5063 = vmatmul.mubr.msk.bf16.vlgmr.msra.gmra.mxu0 %vm183_vm4, %v6060_v1 }
 0x976   :  { %5051 = vmatpush3.bf16.msra.mxu1 %v5329_v34  ;;  %5075 = vmatpush3.bf16.msra.mxu0 %v5330_v35 }
 0x977   :  { %5052 = vmatprep.subr.bf16.mxu1 %v5476_v2  ;;  %5076 = vmatprep.subr.bf16.mxu0 %v5476_v2 }
 0x978   :  { %5054 = vmatprep.mubr.msk.bf16.mxu1 %vm5477_vm0, %v5476_v2  ;;  %5078 = vmatprep.mubr.msk.bf16.mxu0 %vm5477_vm0, %v5476_v2 }
 0x97a   :  { %5053 = vmatpush3.bf16.msra.mxu1 %v5331_v37  ;;  %5077 = vmatpush3.bf16.msra.mxu0 %v5332_v39 }
 0x97b   :  { %5066 = vmatprep.subr.bf16.mxu1 %v5476_v2  ;;  %5090 = vmatprep.subr.bf16.mxu0 %v5476_v2 }
 0x97d   :  { %5055 = vmatmul.mubr.msk.bf16.vlgmr.msra.gmra.mxu1 %vm183_vm4, %v6060_v1  ;;  %5079 = vmatmul.mubr.msk.bf16.vlgmr.msra.gmra.mxu0 %vm183_vm4, %v6060_v1 }
 0x97e   :  { %5067 = vmatpush3.bf16.msra.mxu1 %v5333_v40  ;;  %5091 = vmatpush3.bf16.msra.mxu0 %v5334_v41 }
 0x97f   :  { %5068 = vmatprep.subr.bf16.mxu1 %v5476_v2  ;;  %5092 = vmatprep.subr.bf16.mxu0 %v5476_v2 }
 0x980   :  { %5070 = vmatprep.mubr.msk.bf16.mxu1 %vm5477_vm0, %v5476_v2  ;;  %5094 = vmatprep.mubr.msk.bf16.mxu0 %vm5477_vm0, %v5476_v2 }
 0x982   :  { %5069 = vmatpush3.bf16.msra.mxu1 %v5335_v42  ;;  %5093 = vmatpush3.bf16.msra.mxu0 %v5336_v43 }
 0x983   :  { %5082 = vmatprep.subr.bf16.mxu1 %v5476_v2  ;;  %5106 = vmatprep.subr.bf16.mxu0 %v5476_v2 }
 0x985   :  { %5071 = vmatmul.mubr.msk.bf16.vlgmr.msra.gmra.mxu1 %vm183_vm4, %v6060_v1  ;;  %5095 = vmatmul.mubr.msk.bf16.vlgmr.msra.gmra.mxu0 %vm183_vm4, %v6060_v1 }
 0x986   :  { %5083 = vmatpush3.bf16.msra.mxu1 %v5337_v46  ;;  %5107 = vmatpush3.bf16.msra.mxu0 %v5338_v44 }
 0x987   :  { %5084 = vmatprep.subr.bf16.mxu1 %v5476_v2  ;;  %5108 = vmatprep.subr.bf16.mxu0 %v5476_v2 }
 0x988   :  { %5086 = vmatprep.mubr.msk.bf16.mxu1 %vm5477_vm0, %v5476_v2  ;;  %5110 = vmatprep.mubr.msk.bf16.mxu0 %vm5477_vm0, %v5476_v2 }
 0x98a   :  { %5085 = vmatpush3.bf16.msra.mxu1 %v5339_v45  ;;  %5109 = vmatpush3.bf16.msra.mxu0 %v5340_v47 }
 0x98b   :  { %5098 = vmatprep.subr.bf16.mxu1 %v5476_v2  ;;  %5122 = vmatprep.subr.bf16.mxu0 %v5476_v2 }
 0x98d   :  { %5087 = vmatmul.mubr.msk.bf16.vlgmr.msra.gmra.mxu1 %vm183_vm4, %v6060_v1  ;;  %5111 = vmatmul.mubr.msk.bf16.vlgmr.msra.gmra.mxu0 %vm183_vm4, %v6060_v1 }
 0x98e   :  { %5099 = vmatpush3.bf16.msra.mxu1 %v5341_v53  ;;  %5102 = vmatprep.mubr.msk.bf16.mxu1 %vm5477_vm0, %v5476_v2 }
 0x98f   :  { %5100 = vmatprep.subr.bf16.mxu1 %v5476_v2  ;;  %5124 = vmatprep.mubr.msk.bf16.mxu0 %vm5477_vm0, %v5476_v2 }
 0x992   :  { %5101 = vmatpush3.bf16.msra.mxu1 %v5342_v48 }
 0x993   :  { %5114 = vmatprep.subr.bf16.mxu1 %v5476_v2 }
 0x995   :  { %5103 = vmatmul.mubr.msk.bf16.vlgmr.msra.gmra.mxu1 %vm183_vm4, %v6060_v1 }
 0x996   :  { %5115 = vmatpush3.bf16.msra.mxu1 %v5343_v8  ;;  %5118 = vmatprep.mubr.msk.bf16.mxu1 %vm5477_vm0, %v5476_v2 }
 0x997   :  { %5116 = vmatprep.subr.bf16.mxu1 %v5476_v2 }
 0x99a   :  { %5117 = vmatpush3.bf16.msra.mxu1 %v5344_v49 }
 0x99b   :  { %5128 = vmatprep.subr.bf16.mxu1 %v5476_v2 }
 0x99d   :  { %5119 = vmatmul.mubr.msk.bf16.vlgmr.msra.gmra.mxu1 %vm183_vm4, %v6060_v1 }
 0x99e   :  { %5130 = vmatprep.mubr.msk.bf16.mxu1 %vm5477_vm0, %v5476_v2 }
 0xa2d   :  { %v2336_v9 = vpop.f32.mrf.mxu1  ;;  %v6184_v7 = vpop.f32.mrf.mxu0 }
 0xa2e   :  { %v2926_v16 = vpack.c.bf16 %v2336_v9, %v2336_v9  ;;  %v2930_v49 = vpack.c.bf16 %v6184_v7, %v6184_v7 }
 0xa2f   :  { %v5032_v51 = vpop.f32.mrf.mxu1  ;;  %v5048_v52 = vpop.f32.mrf.mxu0 }
 0xa31   :  { %v2339_v50 = vpop.f32.mrf.mxu1  ;;  %v6186_v54 = vpop.f32.mrf.mxu0 }
 0xa32   :  { %v2927_v22 = vpack.c.bf16 %v2339_v50, %v2339_v50 }
 0xa33   :  { %v5033_v13 = vpop.f32.mrf.mxu1  ;;  %v5049_v55 = vpop.f32.mrf.mxu0 }
 0xa34   :  { %v2931_v13 = vpack.c.bf16 %v6186_v54, %v6186_v54 }
 0xa35   :  { %v2389_v57 = vpop.f32.mrf.mxu1  ;;  %v2548_v58 = vpop.f32.mrf.mxu0 }
 0xa36   :  { %v2934_v60 = vpack.c.bf16 %v2548_v58, %v2548_v58  ;;  %v2928_v37 = vpack.c.bf16 %v2389_v57, %v2389_v57 }
 0xa37   :  { %v5040_v56 = vpop.f32.mrf.mxu1  ;;  %v5064_v61 = vpop.f32.mrf.mxu0 }
 0xa38   :  { %v2954_v63 = vsel %vm919_vm5, %v2934_v60, 0 }
 0xa39   :  { %v2392_v62 = vpop.f32.mrf.mxu1  ;;  %v2551_v0 = vpop.f32.mrf.mxu0  ;;  %5123 = vmatpush3.bf16.xpose.msra.mxu0 %v2954_v63 }
 0xa3a   :  { %v2935_v5 = vpack.c.bf16 %v2551_v0, %v2551_v0  ;;  %5134 = vmatprep.subr.bf16.mxu0 %v5476_v2  ;;  %v2929_v44 = vpack.c.bf16 %v2392_v62, %v2392_v62 }
 0xa3b   :  { %v5041_v10 = vpop.f32.mrf.mxu1  ;;  %v5065_v3 = vpop.f32.mrf.mxu0 }
 0xa3c   :  { %v3000_v12 = vsel %vm919_vm5, %v2935_v5, 0 }
 0xa3d   :  { %v6191_v14 = vpop.f32.mrf.mxu1  ;;  %v2654_v11 = vpop.f32.mrf.mxu0  ;;  %5129 = vmatpush3.bf16.xpose.msra.mxu1 %v3000_v12 }
 0xa3e   :  { %5140 = vmatprep.subr.bf16.mxu1 %v5476_v2  ;;  %v2938_v32 = vpack.c.bf16 %v2654_v11, %v2654_v11  ;;  %v2932_v60 = vpack.c.bf16 %v6191_v14, %v6191_v14 }
 0xa3f   :  { %v5056_v17 = vpop.f32.mrf.mxu1  ;;  %v5080_v18 = vpop.f32.mrf.mxu0 }
 0xa40   :  { %5125 = vmatmul.mubr.msk.bf16.vlgmr.msra.gmra.mxu0 %vm919_vm5, %v2926_v16  ;;  %v3138_v41 = vsel %vm919_vm5, %v2938_v32, 0 }
 0xa41   :  { %v6195_v20 = vpop.f32.mrf.mxu1  ;;  %v2657_v21 = vpop.f32.mrf.mxu0  ;;  %5136 = vmatprep.mubr.msk.bf16.mxu0 %vm5477_vm0, %v5476_v2 }
 0xa42   :  { %v2939_v42 = vpack.c.bf16 %v2657_v21, %v2657_v21  ;;  %v2933_v62 = vpack.c.bf16 %v6195_v20, %v6195_v20 }
 0xa43   :  { %v5057_v15 = vpop.f32.mrf.mxu1  ;;  %v5081_v23 = vpop.f32.mrf.mxu0 }
 0xa44   :  { %5131 = vmatmul.mubr.msk.bf16.vlgmr.msra.gmra.mxu1 %vm919_vm5, %v2927_v22  ;;  %v3184_v53 = vsel %vm919_vm5, %v2939_v42, 0 }
 0xa45   :  { %v2601_v24 = vpop.f32.mrf.mxu1  ;;  %v2760_v19 = vpop.f32.mrf.mxu0  ;;  %5142 = vmatprep.mubr.msk.bf16.mxu1 %vm5477_vm0, %v5476_v2 }
 0xa46   :  { %v2936_v25 = vpack.c.bf16 %v2601_v24, %v2601_v24  ;;  %v2942_v55 = vpack.c.bf16 %v2760_v19, %v2760_v19 }
 0xa47   :  { %v5072_v26 = vpop.f32.mrf.mxu1  ;;  %v5096_v27 = vpop.f32.mrf.mxu0 }
 0xa48   :  { %v3046_v28 = vsel %vm919_vm5, %v2936_v25, 0  ;;  %v3426_v56 = vsel %vm1395_vm6, %v2942_v55, 0 }
 0xa49   :  { %v2604_v29 = vpop.f32.mrf.mxu1  ;;  %v6203_v59 = vpop.f32.mrf.mxu0  ;;  %5135 = vmatpush3.bf16.xpose.msra.mxu0 %v3046_v28 }
 0xa4a   :  { %v2937_v30 = vpack.c.bf16 %v2604_v29, %v2604_v29  ;;  %5146 = vmatprep.subr.bf16.mxu0 %v5476_v2  ;;  %v2943_v61 = vpack.c.bf16 %v6203_v59, %v6203_v59 }
 0xa4b   :  { %v5073_v31 = vpop.f32.mrf.mxu1  ;;  %v5097_v1 = vpop.f32.mrf.mxu0 }
 0xa4c   :  { %v3092_v33 = vsel %vm919_vm5, %v2937_v30, 0  ;;  %v3472_v5 = vsel %vm1395_vm6, %v2943_v61, 0 }
 0xa4d   :  { %v2707_v34 = vpop.f32.mrf.mxu1  ;;  %v6207_v35 = vpop.f32.mrf.mxu0  ;;  %5141 = vmatpush3.bf16.xpose.msra.mxu1 %v3092_v33 }
 0xa4e   :  { %5152 = vmatprep.subr.bf16.mxu1 %v5476_v2  ;;  %v2940_v48 = vpack.c.bf16 %v2707_v34, %v2707_v34 }
 0xa4f   :  { %v5088_v39 = vpop.f32.mrf.mxu1  ;;  %v5112_v40 = vpop.f32.mrf.mxu0 }
 0xa50   :  { %5137 = vmatmul.mubr.msk.bf16.vlgmr.msra.gmra.mxu0 %vm919_vm5, %v2928_v37  ;;  %v3230_v51 = vsel %vm919_vm5, %v2940_v48, 0 }
 0xa51   :  { %v2710_v43 = vpop.f32.mrf.mxu1  ;;  %v6212_v46 = vpop.f32.mrf.mxu0  ;;  %5147 = vmatpush3.bf16.xpose.msra.mxu0 %v3138_v41  ;;  %5148 = vmatprep.mubr.msk.bf16.mxu0 %vm5477_vm0, %v5476_v2 }
 0xa52   :  { %5158 = vmatprep.subr.bf16.mxu0 %v5476_v2  ;;  %v2941_v52 = vpack.c.bf16 %v2710_v43, %v2710_v43 }
 0xa53   :  { %v5089_v45 = vpop.f32.mrf.mxu1  ;;  %v5113_v47 = vpop.f32.mrf.mxu0 }
 0xa54   :  { %5143 = vmatmul.mubr.msk.bf16.vlgmr.msra.gmra.mxu1 %vm919_vm5, %v2929_v44  ;;  %v3276_v57 = vsel %vm919_vm5, %v2941_v52, 0 }
 0xa55   :  { %v6219_v8 = vpop.f32.mrf.mxu1  ;;  %5153 = vmatpush3.bf16.xpose.msra.mxu1 %v3184_v53  ;;  %5154 = vmatprep.mubr.msk.bf16.mxu1 %vm5477_vm0, %v5476_v2 }
 0xa56   :  { %5164 = vmatprep.subr.bf16.mxu1 %v5476_v2 }
 0xa57   :  { %v5104_v9 = vpop.f32.mrf.mxu1 }
 0xa58   :  { %5149 = vmatmul.mubr.msk.bf16.vlgmr.msra.gmra.mxu0 %vm919_vm5, %v2930_v49 }
 0xa59   :  { %v6228_v50 = vpop.f32.mrf.mxu1  ;;  %5159 = vmatpush3.bf16.xpose.msra.mxu0 %v3230_v51  ;;  %5160 = vmatprep.mubr.msk.bf16.mxu0 %vm5477_vm0, %v5476_v2 }
 0xa5a   :  { %5170 = vmatprep.subr.bf16.mxu0 %v5476_v2 }
 0xa5b   :  { %v5105_v7 = vpop.f32.mrf.mxu1 }
 0xa5c   :  { %5155 = vmatmul.mubr.msk.bf16.vlgmr.msra.gmra.mxu1 %vm919_vm5, %v2931_v13 }
 0xa5d   :  { %v6237_v58 = vpop.f32.mrf.mxu1  ;;  %5165 = vmatpush3.bf16.xpose.msra.mxu1 %v3276_v57  ;;  %5166 = vmatprep.mubr.msk.bf16.mxu1 %vm5477_vm0, %v5476_v2 }
 0xa5e   :  { %5176 = vmatprep.subr.bf16.mxu1 %v5476_v2 }
 0xa5f   :  { %v5120_v54 = vpop.f32.mrf.mxu1 }
 0xa60   :  { %5161 = vmatmul.mubr.msk.bf16.vlgmr.msra.gmra.mxu0 %vm919_vm5, %v2932_v60 }
 0xa61   :  { %v6248_v63 = vpop.f32.mrf.mxu1  ;;  %5171 = vmatpush3.bf16.msra.mxu0 %v3426_v56  ;;  %5172 = vmatprep.mubr.msk.bf16.mxu0 %vm5477_vm0, %v5476_v2 }
 0xa62   :  { %5182 = vmatprep.subr.bf16.mxu0 %v5476_v2 }
 0xa63   :  { %v5121_v0 = vpop.f32.mrf.mxu1 }
 0xa64   :  { %5167 = vmatmul.mubr.msk.bf16.vlgmr.msra.gmra.mxu1 %vm919_vm5, %v2933_v62 }
 0xa65   :  { %5177 = vmatpush3.bf16.msra.mxu1 %v3472_v5  ;;  %5178 = vmatprep.mubr.msk.bf16.mxu1 %vm5477_vm0, %v5476_v2 }
 0xa66   :  { %5188 = vmatprep.subr.bf16.mxu1 %v5476_v2 }
 0xb00   :  { %v2990_v10 = vpop.f32.mrf.mxu0 }
 0xb01   :  { %v3318_v3 = vadd.f32 %v2990_v10, %v5831_v36 }
 0xb02   :  { %v5126_v12 = vpop.f32.mrf.mxu0 }
 0xb03   :  { %v3326_v14 = vsel %vm919_vm5, %v3318_v3, -inf }
 0xb04   :  { %v3036_v11 = vpop.f32.mrf.mxu1  ;;  %3327 = vmax.xlane.f32.xlu1 %v3326_v14  ;;  %v2993_v16 = vpop.f32.mrf.mxu0 }
 0xb05   :  { %v3319_v17 = vadd.f32 %v3036_v11, %v5833_v38 }
 0xb06   :  { %v5127_v18 = vpop.f32.mrf.mxu0  ;;  %v5132_v20 = vpop.f32.mrf.mxu1 }
 0xb07   :  { %v3329_v21 = vsel %vm919_vm5, %v3319_v17, -inf }
 0xb08   :  { %3330 = vmax.xlane.f32.xlu0 %v3329_v21  ;;  %v3039_v22 = vpop.f32.mrf.mxu1 }
 0xb0a   :  { %v5133_v15 = vpop.f32.mrf.mxu1 }
 0xb10   :  { %v3082_v23 = vpop.f32.mrf.mxu0 }
 0xb11   :  { %v3320_v24 = vadd.f32 %v3082_v23, %v5831_v36 }
 0xb12   :  { %v5138_v19 = vpop.f32.mrf.mxu0 }
 0xb13   :  { %v3332_v25 = vsel %vm919_vm5, %v3320_v24, -inf }
 0xb14   :  { %v3128_v26 = vpop.f32.mrf.mxu1  ;;  %3333 = vmax.xlane.f32.xlu1 %v3332_v25  ;;  %v3085_v27 = vpop.f32.mrf.mxu0 }
 0xb15   :  { %v3321_v28 = vadd.f32 %v3128_v26, %v5833_v38 }
 0xb16   :  { %v5139_v29 = vpop.f32.mrf.mxu0  ;;  %v5144_v59 = vpop.f32.mrf.mxu1 }
 0xb17   :  { %v3335_v30 = vsel %vm919_vm5, %v3321_v28, -inf }
 0xb18   :  { %3336 = vmax.xlane.f32.xlu0 %v3335_v30  ;;  %v3131_v31 = vpop.f32.mrf.mxu1  ;;  %v3174_v1 = vpop.f32.mrf.mxu0 }
 0xb19   :  { %v3322_v32 = vadd.f32 %v3174_v1, %v5831_v36 }
 0xb1a   :  { %v5145_v33 = vpop.f32.mrf.mxu1  ;;  %v5150_v34 = vpop.f32.mrf.mxu0 }
 0xb1b   :  { %v3338_v37 = vsel %vm919_vm5, %v3322_v32, -inf }
 0xb1c   :  { %v3220_v39 = vpop.f32.mrf.mxu1  ;;  %3339 = vmax.xlane.f32.xlu1 %v3338_v37  ;;  %v3177_v40 = vpop.f32.mrf.mxu0 }
 0xb1d   :  { %v3323_v41 = vadd.f32 %v3220_v39, %v5833_v38 }
 0xb1e   :  { %v5151_v42 = vpop.f32.mrf.mxu0  ;;  %v5156_v43 = vpop.f32.mrf.mxu1 }
 0xb1f   :  { %v3341_v44 = vsel %vm919_vm5, %v3323_v41, -inf }
 0xb20   :  { %3342 = vmax.xlane.f32.xlu0 %v3341_v44  ;;  %v3223_v45 = vpop.f32.mrf.mxu1  ;;  %v3266_v47 = vpop.f32.mrf.mxu0 }
 0xb21   :  { %v3324_v53 = vadd.f32 %v3266_v47, %v5831_v36 }
 0xb22   :  { %v5157_v48 = vpop.f32.mrf.mxu1  ;;  %v5162_v49 = vpop.f32.mrf.mxu0 }
 0xb23   :  { %v3344_v9 = vsel %vm919_vm5, %v3324_v53, -inf }
 0xb24   :  { %v3312_v51 = vpop.f32.mrf.mxu1  ;;  %3345 = vmax.xlane.f32.xlu1 %v3344_v9  ;;  %v3269_v52 = vpop.f32.mrf.mxu0 }
 0xb25   :  { %v3325_v13 = vadd.f32 %v3312_v51, %v5833_v38 }
 0xb26   :  { %v5163_v7 = vpop.f32.mrf.mxu0  ;;  %v5168_v55 = vpop.f32.mrf.mxu1 }
 0xb27   :  { %v3347_v57 = vsel %vm919_vm5, %v3325_v13, -inf }
 0xb28   :  { %3348 = vmax.xlane.f32.xlu0 %v3347_v57  ;;  %v3315_v60 = vpop.f32.mrf.mxu1 }
 0xb2a   :  { %v5169_v54 = vpop.f32.mrf.mxu1 }
 0xb8d   :  { %v3328_v56 = vpop.xlane.xlu1 %3327 }
 0xb8e   :  { %v3350_v61 = vsub.f32 %v3318_v3, %v3328_v56  ;;  %v2946_v56 = vpack.c.bf16 %v6207_v35, %v6207_v35 }
 0xb90   :  { %v3358_v62 = vmul.f32 1.442695, %v3350_v61 }
 0xb91   :  { %v3331_v36 = vpop.xlane.xlu0 %3330 }
 0xb92   :  { %5407 = vpow2.f32 %v3358_v62  ;;  %v3351_v0 = vsub.f32 %v3319_v17, %v3331_v36 }
 0xb94   :  { %v3360_v5 = vmul.f32 1.442695, %v3351_v0 }
 0xb96   :  { %5409 = vpow2.f32 %v3360_v5  ;;  %v3610_v5 = vsel %vm1395_vm6, %v2946_v56, 0 }
 0xb9d   :  { %v3334_v10 = vpop.xlane.xlu1 %3333 }
 0xb9e   :  { %v3352_v12 = vsub.f32 %v3320_v24, %v3334_v10  ;;  %v2947_v10 = vpack.c.bf16 %v6212_v46, %v6212_v46 }
 0xb9f   :  { %v5408_v14 = vpop.eup %5407 }
 0xba0   :  { %v3362_v11 = vmul.f32 1.442695, %v3352_v12  ;;  %v3374_v38 = vsel %vm919_vm5, %v5408_v14, 0.0 }
 0xba1   :  { %v3337_v16 = vpop.xlane.xlu0 %3336  ;;  %3375 = vadd.xlane.f32.xlu1 %v3374_v38  ;;  %v3656_v38 = vsel %vm1395_vm6, %v2947_v10, 0 }
 0xba2   :  { %5411 = vpow2.f32 %v3362_v11  ;;  %v3353_v18 = vsub.f32 %v3321_v28, %v3337_v16  ;;  %v2948_v16 = vpack.c.bf16 %v6237_v58, %v6237_v58 }
 0xba3   :  { %v5410_v20 = vpop.eup %5409 }
 0xba4   :  { %v3364_v21 = vmul.f32 1.442695, %v3353_v18  ;;  %v3377_v3 = vsel %vm919_vm5, %v5410_v20, 0.0 }
 0xba5   :  { %3378 = vadd.xlane.f32.xlu0 %v3377_v3  ;;  %v3340_v22 = vpop.xlane.xlu1 %3339  ;;  %v2949_v3 = vpack.c.bf16 %v6248_v63, %v6248_v63 }
 0xba6   :  { %5413 = vpow2.f32 %v3364_v21  ;;  %v3354_v17 = vsub.f32 %v3322_v32, %v3340_v22  ;;  %v3702_v21 = vsel %vm1395_vm6, %v2948_v16, 0 }
 0xba8   :  { %v3366_v15 = vmul.f32 1.442695, %v3354_v17 }
 0xba9   :  { %v3343_v23 = vpop.xlane.xlu0 %3342 }
 0xbaa   :  { %5415 = vpow2.f32 %v3366_v15  ;;  %v3355_v24 = vsub.f32 %v3323_v41, %v3343_v23  ;;  %v3748_v15 = vsel %vm1395_vm6, %v2949_v3, 0 }
 0xbac   :  { %v3368_v19 = vmul.f32 1.442695, %v3355_v24 }
 0xbad   :  { %v3346_v25 = vpop.xlane.xlu1 %3345 }
 0xbae   :  { %5417 = vpow2.f32 %v3368_v19  ;;  %v3356_v26 = vsub.f32 %v3324_v53, %v3346_v25  ;;  %v2944_v53 = vpack.c.bf16 %v6219_v8, %v6219_v8 }
 0xbaf   :  { %v5412_v27 = vpop.eup %5411 }
 0xbb0   :  { %v3370_v29 = vmul.f32 1.442695, %v3356_v26  ;;  %v3380_v28 = vsel %vm919_vm5, %v5412_v27, 0.0  ;;  %v3518_v52 = vsel %vm1395_vm6, %v2944_v53, 0  ;;  %v4544_v26 = vld [vmem:[%s6465_s5 + $0x10] sm:$0xf] }
 0xbb1   :  { %v3349_v59 = vpop.xlane.xlu0 %3348  ;;  %3381 = vadd.xlane.f32.xlu1 %v3380_v28 }
 0xbb2   :  { %5419 = vpow2.f32 %v3370_v29  ;;  %v3357_v30 = vsub.f32 %v3325_v13, %v3349_v59  ;;  %v2945_v13 = vpack.c.bf16 %v6228_v50, %v6228_v50  ;;  %v4545_v29 = vld [vmem:[%s6465_s5 + $0x14] sm:$0xf] }
 0xbb3   :  { %v5414_v31 = vpop.eup %5413  ;;  %v3850_v28 = vsel %vm1395_vm6, %v4545_v29, 0 }
 0xbb4   :  { %v3372_v1 = vmul.f32 1.442695, %v3357_v30  ;;  %v3383_v32 = vsel %vm919_vm5, %v5414_v31, 0.0  ;;  %v3564_v8 = vsel %vm1395_vm6, %v2945_v13, 0 }
 0xbb5   :  { %3384 = vadd.xlane.f32.xlu0 %v3383_v32 }
 0xbb6   :  { %5421 = vpow2.f32 %v3372_v1 }
 0xbb7   :  { %v5416_v33 = vpop.eup %5415 }
 0xbb8   :  { %v3386_v34 = vsel %vm919_vm5, %v5416_v33, 0.0 }
 0xbb9   :  { %3387 = vadd.xlane.f32.xlu1 %v3386_v34 }
 0xbbb   :  { %v6281_v37 = vpop.eup %5417 }
 0xbbc   :  { %v3389_v39 = vsel %vm919_vm5, %v6281_v37, 0.0 }
 0xbbd   :  { %3390 = vadd.xlane.f32.xlu0 %v3389_v39 }
 0xbbf   :  { %v6285_v40 = vpop.eup %5419 }
 0xbc0   :  { %v3392_v41 = vsel %vm919_vm5, %v6285_v40, 0.0 }
 0xbc1   :  { %3393 = vadd.xlane.f32.xlu1 %v3392_v41 }
 0xbc3   :  { %v6289_v42 = vpop.eup %5421 }
 0xbc4   :  { %v3395_v43 = vsel %vm919_vm5, %v6289_v42, 0.0 }
 0xbc5   :  { %3396 = vadd.xlane.f32.xlu0 %v3395_v43 }
 0xc2a   :  { %v3376_v44 = vpop.xlane.xlu1 %3375 }
 0xc2b   :  { %5423 = vrcp.f32 %v3376_v44  ;;  %v4547_v44 = vld [vmem:[%s6465_s5 + $0x1c] sm:$0xf] }
 0xc2e   :  { %v3379_v45 = vpop.xlane.xlu0 %3378 }
 0xc2f   :  { %5425 = vrcp.f32 %v3379_v45 }
 0xc38   :  { %v5424_v47 = vpop.eup %5423 }
 0xc39   :  { %v3406_v48 = vmul.f32 %v5424_v47, %v5408_v14 }
 0xc3a   :  { %v3382_v49 = vpop.xlane.xlu1 %3381 }
 0xc3b   :  { %5427 = vrcp.f32 %v3382_v49  ;;  %v3414_v9 = vpack.c.bf16 %v3406_v48, %v3406_v48  ;;  %v3944_v48 = vsel %vm1395_vm6, %v4547_v44, 0 }
 0xc3c   :  { %v5426_v51 = vpop.eup %5425 }
 0xc3d   :  { %v3407_v7 = vmul.f32 %v5426_v51, %v5410_v20  ;;  %5173 = vmatmul.mubr.msk.bf16.vlgmr.msra.gmra.mxu0 %vm919_vm5, %v3414_v9 }
 0xc3e   :  { %5183 = vmatpush3.bf16.msra.mxu0 %v3518_v52  ;;  %v3385_v55 = vpop.xlane.xlu0 %3384  ;;  %5184 = vmatprep.mubr.msk.bf16.mxu0 %vm5477_vm0, %v5476_v2 }
 0xc3f   :  { %v3415_v57 = vpack.c.bf16 %v3407_v7, %v3407_v7  ;;  %5429 = vrcp.f32 %v3385_v55  ;;  %5194 = vmatprep.subr.bf16.mxu0 %v5476_v2 }
 0xc41   :  { %5179 = vmatmul.mubr.msk.bf16.vlgmr.msra.gmra.mxu1 %vm919_vm5, %v3415_v57 }
 0xc42   :  { %5189 = vmatpush3.bf16.msra.mxu1 %v3564_v8  ;;  %v3388_v60 = vpop.xlane.xlu1 %3387  ;;  %5190 = vmatprep.mubr.msk.bf16.mxu1 %vm5477_vm0, %v5476_v2 }
 0xc43   :  { %5431 = vrcp.f32 %v3388_v60  ;;  %5200 = vmatprep.subr.bf16.mxu1 %v5476_v2 }
 0xc46   :  { %v3391_v50 = vpop.xlane.xlu0 %3390 }
 0xc47   :  { %5433 = vrcp.f32 %v3391_v50 }
 0xc48   :  { %v5428_v54 = vpop.eup %5427 }
 0xc49   :  { %v3408_v61 = vmul.f32 %v5428_v54, %v5412_v27  ;;  %v3803_v27 = vsel %vm1395_vm6, %v4544_v26, 0 }
 0xc4a   :  { %v3394_v62 = vpop.xlane.xlu1 %3393 }
 0xc4b   :  { %v3416_v36 = vpack.c.bf16 %v3408_v61, %v3408_v61  ;;  %5435 = vrcp.f32 %v3394_v62 }
 0xc4c   :  { %v5430_v0 = vpop.eup %5429 }
 0xc4d   :  { %v3409_v12 = vmul.f32 %v5430_v0, %v5414_v31  ;;  %5185 = vmatmul.mubr.msk.bf16.vlgmr.msra.gmra.mxu0 %vm919_vm5, %v3416_v36  ;;  %v4546_v31 = vld [vmem:[%s6465_s5 + $0x18] sm:$0xf] }
 0xc4e   :  { %5195 = vmatpush3.bf16.msra.mxu0 %v3610_v5  ;;  %v3397_v14 = vpop.xlane.xlu0 %3396  ;;  %5196 = vmatprep.mubr.msk.bf16.mxu0 %vm5477_vm0, %v5476_v2  ;;  %v3897_v34 = vsel %vm1395_vm6, %v4546_v31, 0 }
 0xc4f   :  { %v3417_v11 = vpack.c.bf16 %v3409_v12, %v3409_v12  ;;  %5437 = vrcp.f32 %v3397_v14  ;;  %5206 = vmatprep.subr.bf16.mxu0 %v5476_v2 }
 0xc50   :  { %v5432_v35 = vpop.eup %5431 }
 0xc51   :  { %v3410_v18 = vmul.f32 %v5432_v35, %v5416_v33  ;;  %5191 = vmatmul.mubr.msk.bf16.vlgmr.msra.gmra.mxu1 %vm919_vm5, %v3417_v11 }
 0xc52   :  { %5201 = vmatpush3.bf16.msra.mxu1 %v3656_v38  ;;  %5202 = vmatprep.mubr.msk.bf16.mxu1 %vm5477_vm0, %v5476_v2 }
 0xc53   :  { %v3418_v46 = vpack.c.bf16 %v3410_v18, %v3410_v18  ;;  %5212 = vmatprep.subr.bf16.mxu1 %v5476_v2 }
 0xc54   :  { %v5434_v20 = vpop.eup %5433 }
 0xc55   :  { %v3411_v22 = vmul.f32 %v5434_v20, %v6281_v37  ;;  %5197 = vmatmul.mubr.msk.bf16.vlgmr.msra.gmra.mxu0 %vm919_vm5, %v3418_v46 }
 0xc56   :  { %5207 = vmatpush3.bf16.msra.mxu0 %v3702_v21  ;;  %5208 = vmatprep.mubr.msk.bf16.mxu0 %vm5477_vm0, %v5476_v2 }
 0xc57   :  { %v3419_v58 = vpack.c.bf16 %v3411_v22, %v3411_v22  ;;  %5218 = vmatprep.subr.bf16.mxu0 %v5476_v2 }
 0xc58   :  { %v5436_v17 = vpop.eup %5435 }
 0xc59   :  { %v3412_v23 = vmul.f32 %v5436_v17, %v6285_v40  ;;  %5203 = vmatmul.mubr.msk.bf16.vlgmr.msra.gmra.mxu1 %vm919_vm5, %v3419_v58 }
 0xc5a   :  { %5213 = vmatpush3.bf16.msra.mxu1 %v3748_v15  ;;  %5214 = vmatprep.mubr.msk.bf16.mxu1 %vm5477_vm0, %v5476_v2 }
 0xc5b   :  { %v3420_v63 = vpack.c.bf16 %v3412_v23, %v3412_v23  ;;  %5224 = vmatprep.subr.bf16.mxu1 %v5476_v2 }
 0xc5c   :  { %v5438_v24 = vpop.eup %5437 }
 0xc5d   :  { %v3413_v19 = vmul.f32 %v5438_v24, %v6289_v42  ;;  %5209 = vmatmul.mubr.msk.bf16.vlgmr.msra.gmra.mxu0 %vm919_vm5, %v3420_v63 }
 0xc5e   :  { %5220 = vmatprep.mubr.msk.bf16.mxu0 %vm5477_vm0, %v5476_v2  ;;  %5219 = vmatpush3.bf16.msra.mxu0 %v3803_v27 }
 0xc5f   :  { %v3421_v25 = vpack.c.bf16 %v3413_v19, %v3413_v19  ;;  %5230 = vmatprep.subr.bf16.mxu0 %v5476_v2 }
 0xc61   :  { %5215 = vmatmul.mubr.msk.bf16.vlgmr.msra.gmra.mxu1 %vm919_vm5, %v3421_v25 }
 0xc62   :  { %5226 = vmatprep.mubr.msk.bf16.mxu1 %vm5477_vm0, %v5476_v2  ;;  %5225 = vmatpush3.bf16.msra.mxu1 %v3850_v28 }
 0xc63   :  { %5236 = vmatprep.subr.bf16.mxu1 %v5476_v2 }
 0xcfd   :  { %v3462_v59 = vpop.f32.mrf.mxu0 }
 0xcff   :  { %v5174_v30 = vpop.f32.mrf.mxu0 }
 0xd01   :  { %v3465_v1 = vpop.f32.mrf.mxu0  ;;  %v3508_v32 = vpop.f32.mrf.mxu1 }
 0xd02   :  { %v3790_v33 = vpack.c.bf16 %v3508_v32, %v3462_v59 }
 0xd03   :  { %v5175_v37 = vpop.f32.mrf.mxu0  ;;  %v5180_v39 = vpop.f32.mrf.mxu1 }
 0xd04   :  { %5221 = vmatmul.mubr.msk.bf16.vlgmr.msra.gmra.mxu0 %vm919_vm5, %v3790_v33 }
 0xd05   :  { %v3511_v40 = vpop.f32.mrf.mxu1  ;;  %5231 = vmatpush3.bf16.msra.mxu0 %v3897_v34  ;;  %5232 = vmatprep.mubr.msk.bf16.mxu0 %vm5477_vm0, %v5476_v2 }
 0xd06   :  { %5242 = vmatprep.subr.bf16.mxu0 %v5476_v2 }
 0xd07   :  { %v5181_v41 = vpop.f32.mrf.mxu1 }
 0xd0d   :  { %v3554_v42 = vpop.f32.mrf.mxu0 }
 0xd0f   :  { %v5186_v43 = vpop.f32.mrf.mxu0 }
 0xd11   :  { %v3557_v45 = vpop.f32.mrf.mxu0  ;;  %v3600_v47 = vpop.f32.mrf.mxu1 }
 0xd12   :  { %v3791_v53 = vpack.c.bf16 %v3600_v47, %v3554_v42  ;;  %v5345_v45 = vld [vmem:[%s6467_s7 + $0x18] sm:$0xff]  }
 0xd13   :  { %v5187_v49 = vpop.f32.mrf.mxu0  ;;  %v5192_v9 = vpop.f32.mrf.mxu1  ;;  %v5346_v47 = vld [vmem:[%s6468_s8 + $0x18] sm:$0xff]  }
 0xd14   :  { %5227 = vmatmul.mubr.msk.bf16.vlgmr.msra.gmra.mxu1 %vm919_vm5, %v3791_v53  ;;  %v5348_v53 = vld [vmem:[%s6468_s8 + $0x10] sm:$0xff]  }
 0xd15   :  { %v3603_v51 = vpop.f32.mrf.mxu1  ;;  %v3646_v52 = vpop.f32.mrf.mxu0  ;;  %5237 = vmatpush3.bf16.msra.mxu1 %v3944_v48  ;;  %5238 = vmatprep.mubr.msk.bf16.mxu1 %vm5477_vm0, %v5476_v2 }
 0xd16   :  { %5250 = vmatprep.subr.bf16.mxu1 %v5476_v2 }
 0xd17   :  { %v5193_v13 = vpop.f32.mrf.mxu1  ;;  %v5198_v7 = vpop.f32.mrf.mxu0 }
 0xd19   :  { %v3649_v55 = vpop.f32.mrf.mxu0  ;;  %v3692_v57 = vpop.f32.mrf.mxu1 }
 0xd1a   :  { %v3792_v8 = vpack.c.bf16 %v3692_v57, %v3646_v52 }
 0xd1b   :  { %v5199_v60 = vpop.f32.mrf.mxu0  ;;  %v5204_v50 = vpop.f32.mrf.mxu1 }
 0xd1c   :  { %5233 = vmatmul.mubr.msk.bf16.vlgmr.msra.gmra.mxu0 %vm919_vm5, %v3792_v8  ;;  %v4553_v8 = vld [vmem:[%s6466_s6 + $0x1] ss:$0 sm:$0xff] }
 0xd1d   :  { %v3695_v54 = vpop.f32.mrf.mxu1  ;;  %v3738_v56 = vpop.f32.mrf.mxu0  ;;  %5246 = vmatprep.mubr.msk.bf16.mxu0 %vm5477_vm0, %v5476_v2  ;;  %5243 = vmatpush3.bf16.msra.mxu0 %v5345_v45 }
 0xd1e   :  { %5244 = vmatprep.subr.bf16.mxu0 %v5476_v2 }
 0xd1f   :  { %v5205_v61 = vpop.f32.mrf.mxu1  ;;  %v5210_v62 = vpop.f32.mrf.mxu0 }
 0xd20   :  { %v5349_v61 = vld [vmem:[%s6469_s9 + $0x38] sm:$0xff]   ;;  %v5350_v62 = vld [vmem:[%s6469_s9 + $0x30] sm:$0xff]  }
 0xd21   :  { %v3741_v36 = vpop.f32.mrf.mxu0  ;;  %v3784_v0 = vpop.f32.mrf.mxu1 }
 0xd22   :  { %v3793_v5 = vpack.c.bf16 %v3784_v0, %v3738_v56  ;;  %v5351_v36 = vld [vmem:[%s6469_s9 + $0x28] sm:$0xff]   ;;  %v5352_v0 = vld [vmem:[%s6469_s9 + $0x20] sm:$0xff]  }
 0xd23   :  { %v5211_v10 = vpop.f32.mrf.mxu0  ;;  %v5216_v12 = vpop.f32.mrf.mxu1 }
 0xd24   :  { %5239 = vmatmul.mubr.msk.bf16.vlgmr.msra.gmra.mxu1 %vm919_vm5, %v3793_v5 }
 0xd25   :  { %v3787_v14 = vpop.f32.mrf.mxu1  ;;  %5254 = vmatprep.mubr.msk.bf16.mxu1 %vm5477_vm0, %v5476_v2  ;;  %5251 = vmatpush3.bf16.msra.mxu1 %v5346_v47 }
 0xd26   :  { %5252 = vmatprep.subr.bf16.mxu1 %v5476_v2 }
 0xd27   :  { %v5217_v11 = vpop.f32.mrf.mxu1 }
 0xd29   :  { %5253 = vmatpush3.bf16.msra.mxu1 %v5348_v53 }
 0xd2a   :  { %5270 = vmatprep.subr.bf16.mxu1 %v5476_v2 }
 0xdc4   :  { %v3839_v35 = vpop.f32.mrf.mxu0 }
 0xdc5   :  { %v3987_v23 = vsel %vm183_vm4, %v3839_v35, 0.0 }
 0xdc6   :  { %v5222_v38 = vpop.f32.mrf.mxu0 }
 0xdc8   :  { %v3842_v16 = vpop.f32.mrf.mxu0 }
 0xdc9   :  { %v3994_v29 = vsel %vm183_vm4, %v3842_v16, 0.0 }
 0xdca   :  { %v5223_v18 = vpop.f32.mrf.mxu0 }
 0xdd4   :  { %v3886_v46 = vpop.f32.mrf.mxu1 }
 0xdd5   :  { %v3988_v17 = vsel %vm183_vm4, %v3886_v46, 0.0 }
 0xdd6   :  { %v5228_v20 = vpop.f32.mrf.mxu1  ;;  %v3989_v24 = vadd.f32 %v3988_v17, %v3987_v23 }
 0xdd8   :  { %v3889_v21 = vpop.f32.mrf.mxu1 }
 0xdd9   :  { %v3995_v25 = vsel %vm183_vm4, %v3889_v21, 0.0 }
 0xdda   :  { %v5229_v3 = vpop.f32.mrf.mxu1  ;;  %v3996_v30 = vadd.f32 %v3995_v25, %v3994_v29 }
 0xddc   :  { %v3933_v22 = vpop.f32.mrf.mxu0 }
 0xddd   :  { %v3990_v63 = vsel %vm183_vm4, %v3933_v22, 0.0 }
 0xdde   :  { %v5234_v58 = vpop.f32.mrf.mxu0  ;;  %v3991_v26 = vadd.f32 %v3990_v63, %v3989_v24 }
 0xde0   :  { %v3936_v15 = vpop.f32.mrf.mxu0 }
 0xde1   :  { %v3997_v28 = vsel %vm183_vm4, %v3936_v15, 0.0 }
 0xde2   :  { %v5235_v19 = vpop.f32.mrf.mxu0  ;;  %v3998_v32 = vadd.f32 %v3997_v28, %v3996_v30 }
 0xde4   :  { %v3980_v27 = vpop.f32.mrf.mxu1 }
 0xde5   :  { %v3992_v59 = vsel %vm183_vm4, %v3980_v27, 0.0 }
 0xde6   :  { %v3993_v31 = vadd.f32 %v3992_v59, %v3991_v26  ;;  %v5240_v1 = vpop.f32.mrf.mxu1 }
 0xde8   :  { %v6384_v33 = vadd.f32 %v3993_v31, %v6022_v4  ;;  %v3983_v34 = vpop.f32.mrf.mxu1 }
 0xde9   :  { %v3999_v37 = vsel %vm183_vm4, %v3983_v34, 0.0 }
 0xdea   :  { %v4000_v39 = vadd.f32 %v3999_v37, %v3998_v32  ;;  %v5241_v40 = vpop.f32.mrf.mxu1  ;;  %v4005_v41 = vmul.f32 %v6384_v33, %v6384_v33  ;;  %v5353_v37 = vld [vmem:[%s6471_s11 + $0x8] sm:$0xff]  }
 0xdec   :  { %v6390_v42 = vadd.f32 %v4000_v39, %v6027_v6  ;;  %v4007_v43 = vsel %vm183_vm4, %v4005_v41, 0.0  ;;  %v5347_v6 = vld [vmem:[%s6467_s7 + $0x10] sm:$0xff]  }
 0xded   :  { %4008 = vadd.xlane.f32.xlu1 %v4007_v43  ;;  %5245 = vmatpush3.bf16.msra.mxu0 %v5347_v6  ;;  %v4583_v43 = vld [vmem:[%s6470_s10] ss:$0 sm:$0xff]  ;;  %s5480_s10 = smov [#allocation2]  }
 0xdee   :  { %v4006_v44 = vmul.f32 %v6390_v42, %v6390_v42  ;;  %5258 = vmatprep.subr.bf16.mxu0 %v5476_v2  ;;  %s4358_s14 = sshll.u32 %s5480_s10, 4  ;;  %s4359_s14 = int_to_ptr.vmem [resolvable:$true] %s4358_s14 }
 0xdef   :  { %s5453_s3 = scalar_lea.vmem %s4359_s14, 32  ;;  %p5458_p1 = scmp.lt.s32.totalorder %s4359_s14, %s4359_s14 }
 0xdf0   :  { %v4010_v4 = vsel %vm183_vm4, %v4006_v44, 0.0  ;;  %p5454_p0 = scmp.ne.s32.totalorder %s4359_s14, %s5453_s3  ;;  %p5459_p2 = scmp.lt.s32.totalorder %s5453_s3, %s5453_s3 }
 0xdf1   :  { %4011 = vadd.xlane.f32.xlu0 %v4010_v4 }
 0xdf2   :  { %p5460_p3 = por %p5459_p2, %p5458_p1 }
 0xdf4   :  { %p5461_p4 = pnand %p5460_p3, %p5454_p0 }
 0xe76   :  { %v4009_v48 = vpop.xlane.xlu1 %4008 }
 0xe77   :  { %v4013_v49 = vmul.f32 0.03125, %v4009_v48 }
 0xe79   :  { %v4015_v9 = vadd.f32 1e-06, %v4013_v49 }
 0xe7a   :  { %v4012_v51 = vpop.xlane.xlu0 %4011 }
 0xe7b   :  { %5439 = vrsqrt.f32 %v4015_v9  ;;  %v4014_v52 = vmul.f32 0.03125, %v4012_v51 }
 0xe7d   :  { %v4016_v13 = vadd.f32 1e-06, %v4014_v52 }
 0xe7f   :  { %5441 = vrsqrt.f32 %v4016_v13  ;;  %v4584_v13 = vld [vmem:[%s6472_s12] ss:$0 sm:$0xff] }
 0xe88   :  { %v5440_v7 = vpop.eup %5439 }
 0xe89   :  { %v4019_v55 = vmul.f32 %v5440_v7, %v6384_v33 }
 0xe8b   :  { %v4027_v50 = vmul.f32 %v4553_v8, %v4019_v55 }
 0xe8c   :  { %v5442_v57 = vpop.eup %5441 }
 0xe8d   :  { %v4020_v60 = vmul.f32 %v5442_v57, %v6390_v42 }
 0xe8f   :  { %v4028_v54 = vmul.f32 %v4553_v8, %v4020_v60 }
 0xe91   :  { %v4029_v56 = vpack.c.bf16 %v4028_v54, %v4027_v50 }
 0xe93   :  { %5247 = vmatmul.mubr.msk.bf16.vlgmr.msra.gmra.mxu0 %vm183_vm4, %v4029_v56  ;;  %5255 = vmatmul.mubr.msk.bf16.vlgmr.msra.gmra.mxu1 %vm183_vm4, %v4029_v56 }
 0xe94   :  { %5266 = vmatprep.mubr.msk.bf16.mxu0 %vm5477_vm0, %v5476_v2  ;;  %5274 = vmatprep.mubr.msk.bf16.mxu1 %vm5477_vm0, %v5476_v2 }
 0xe95   :  { %5259 = vmatpush3.bf16.msra.mxu0 %v5349_v61  ;;  %5271 = vmatpush3.bf16.msra.mxu1 %v5353_v37 }
 0xe96   :  { %5260 = vmatprep.subr.bf16.mxu0 %v5476_v2  ;;  %5272 = vmatprep.subr.bf16.mxu1 %v5476_v2 }
 0xe99   :  { %5261 = vmatpush3.bf16.msra.mxu0 %v5350_v62 }
 0xe9a   :  { %5262 = vmatprep.subr.bf16.mxu0 %v5476_v2 }
 0xe9d   :  { %5263 = vmatpush3.bf16.msra.mxu0 %v5351_v36 }
 0xe9e   :  { %5264 = vmatprep.subr.bf16.mxu0 %v5476_v2 }
 0xea1   :  { %5265 = vmatpush3.bf16.msra.mxu0 %v5352_v0 }
 0xf53   :  { %v4084_v5 = vpop.f32.mrf.mxu0  ;;  %v4142_v10 = vpop.f32.mrf.mxu1 }
 0xf54   :  { %v4568_v12 = vmul.f32 -1.442695, %v4084_v5 }
 0xf55   :  { %v5248_v14 = vpop.f32.mrf.mxu0  ;;  %v5256_v11 = vpop.f32.mrf.mxu1 }
 0xf56   :  { %5443 = vpow2.f32 %v4568_v12 }
 0xf57   :  { %v4087_v35 = vpop.f32.mrf.mxu0  ;;  %v4145_v38 = vpop.f32.mrf.mxu1 }
 0xf58   :  { %v4569_v16 = vmul.f32 -1.442695, %v4087_v35 }
 0xf59   :  { %v5249_v18 = vpop.f32.mrf.mxu0  ;;  %v5257_v46 = vpop.f32.mrf.mxu1 }
 0xf5a   :  { %5445 = vpow2.f32 %v4569_v16 }
 0xf63   :  { %v5444_v20 = vpop.eup %5443 }
 0xf64   :  { %v4155_v21 = vadd.f32 1.0, %v5444_v20 }
 0xf66   :  { %5447 = vrcp.f32 %v4155_v21 }
 0xf67   :  { %v5446_v3 = vpop.eup %5445 }
 0xf68   :  { %v4156_v22 = vadd.f32 1.0, %v5446_v3 }
 0xf6a   :  { %5449 = vrcp.f32 %v4156_v22 }
 0xf73   :  { %v5448_v58 = vpop.eup %5447 }
 0xf74   :  { %v4161_v17 = vmul.f32 %v5448_v58, %v4084_v5 }
 0xf76   :  { %v4163_v63 = vmul.f32 %v4161_v17, %v4142_v10 }
 0xf77   :  { %v5450_v15 = vpop.eup %5449 }
 0xf78   :  { %v4162_v23 = vmul.f32 %v5450_v15, %v4087_v35 }
 0xf7a   :  { %v4164_v24 = vmul.f32 %v4162_v23, %v4145_v38 }
 0xf7c   :  { %v4165_v19 = vpack.c.bf16 %v4164_v24, %v4163_v63 }
 0xf7e   :  { %5267 = vmatmul.mubr.msk.bf16.vlgmr.msra.gmra.mxu0 %vm93_vm3, %v4165_v19 }
0x103e   :  { %v4236_v25 = vpop.f32.mrf.mxu0 }
0x103f   :  { %v4243_v29 = vadd.f32 %v4236_v25, %v6384_v33  ;;  %v5354_v33 = vld [vmem:[%s6471_s11] sm:$0xff]  }
0x1040   :  { %v5268_v26 = vpop.f32.mrf.mxu0  ;;  %5273 = vmatpush3.bf16.msra.mxu1 %v5354_v33 }
0x1041   :  { %v4246_v31 = vmul.f32 %v4243_v29, %v4243_v29 }
0x1042   :  { %v4239_v27 = vpop.f32.mrf.mxu0 }
0x1043   :  { %v4244_v28 = vadd.f32 %v4239_v27, %v6390_v42 }
0x1044   :  { %v5269_v59 = vpop.f32.mrf.mxu0 }
0x1045   :  { %v4247_v30 = vmul.f32 %v4244_v28, %v4244_v28 }
0x1047   :  { %v4250_v1 = vrot.slane %v4247_v30, 7 }
0x1049   :  { %v4252_v32 = vsel %vm4251_vm8, %v4250_v1, %v4246_v31 }
0x104a   :  { %v4255_v34 = vsel %vm4254_vm9, %v4252_v32, 0.0 }
0x104b   :  { %4256 = vadd.xlane.f32.xlu1 %v4255_v34 }
0x10d4   :  { %v4257_v39 = vpop.xlane.xlu1 %4256 }
0x10d5   :  { %v4258_v40 = vmul.f32 0.03125, %v4257_v39 }
0x10d7   :  { %v4259_v41 = vadd.f32 1e-06, %v4258_v40 }
0x10d9   :  { %5451 = vrsqrt.f32 %v4259_v41 }
0x10e6   :  { %v5452_v42 = vpop.eup %5451 }
0x10e7   :  { %v4262_v44 = vrot.slane %v5452_v42, 1  ;;  %v4265_v4 = vmul.f32 %v5452_v42, %v4243_v29 }
0x10e9   :  { %v4266_v45 = vmul.f32 %v4262_v44, %v4244_v28  ;;  %v4273_v47 = vmul.f32 %v4583_v43, %v4265_v4 }
0x10eb   :  { %v4274_v6 = vmul.f32 %v4583_v43, %v4266_v45  ;;  %v4275_v2 = vpack.c.bf16 %v4273_v47, %v4273_v47 }
0x10ed   :  { %v4276_v53 = vpack.c.bf16 %v4274_v6, %v4274_v6  ;;  %v4290_v49 = vunpack.c.l.b16 %v4275_v2 }
0x10ef   :  { %v4291_v48 = vunpack.c.l.b16 %v4276_v53 }
0x10f1   :  { %v4292_v9 = vrot.slane %v4291_v48, 7 }
0x10f3   :  { %v4293_v51 = vsel %vm4251_vm8, %v4292_v9, %v4290_v49 }
0x10f4   :  { %v4294_v52 = vpack.c.b16 %v4293_v51, %v4293_v51 }
0x10f6   :  { %5275 = vmatmul.mubr.msk.bf16.vlgmr.msra.gmra.mxu1 %vm183_vm4, %v4294_v52 }
0x11b6   :  { %v4344_v7 = vpop.f32.mrf.mxu1 }
0x11b7   :  { %v4345_v55 = vadd.f32 %v4584_v13, %v4344_v7 }
0x11b8   :  { %v5276_v57 = vpop.f32.mrf.mxu1 }
0x11b9   :  { %4351 = vst.msk [vmem:[#allocation2] sm:$0x3] %vm4350_vm10, %v4345_v55 }
0x11ba   :  { %v4347_v8 = vpop.f32.mrf.mxu1 }
0x11bb   :  { %5464 = shalt.err (!%p5461_p4)
}
0x11bc   :  { %4361 = dma.vmem_to_hbm [thread:$0]  %s4359_s14, 32, %s6473_s13, [#allocation3]   ;;  %v5277_v60 = vpop.f32.mrf.mxu1 }
0x11bd   :  { %5473 = dma.done.wait [#allocation3], 32  }
0x11be   :  { %5474 = vsyncadd [#allocation3], 4294967264 }
0x11bf   :  { %4365 = vsyncpa [#allocation3], 1 }

</bundles_post_ra>
